<compile_context>
chip_gen: v7x
topology: tpu7x:2x2x1
jax: 0.10.0
libtpu: 0.0.40
codegen_flags: <defaults>
</compile_context>

<pallas_src>
import jax
import jax.numpy as jnp
from jax.experimental import pallas as pl
from jax.experimental.pallas import tpu as pltpu


_LANE = 128
_NEG_BIG = -1e30  # drives padded softmax lanes to exp(.) == 0 exactly (f32)


def _round_up(n, m):
    return ((n + m - 1) // m) * m


def policy_kernel(x_ref, w1_ref, b1_ref, w2_ref, b2_ref, o_ref):
    # x_ref: (TB, I), w1_ref: (I, Hp), b1_ref: (1, Hp),
    # w2_ref: (Hp, Op), b2_ref: (1, Op), o_ref: (TB, Op)
    x = x_ref[...]
    h = jnp.dot(x, w1_ref[...], preferred_element_type=jnp.float32)      # (TB, Hp)
    h = jnp.maximum(h + b1_ref[...], 0.0)                                # ReLU
    logits = jnp.dot(h, w2_ref[...],
                     preferred_element_type=jnp.float32) + b2_ref[...]   # (TB, Op)
    # Padded output lanes have bias -1e30: never win the max, exp underflows
    # to 0, so they don't perturb the softmax denominator and store as 0.
    m = jnp.max(logits, axis=1, keepdims=True)
    e = jnp.exp(logits - m)
    denom = jnp.sum(e, axis=1, keepdims=True)
    inv = pl.reciprocal(denom, approx=True)        # EUP slot (free vs. VALU divide)
    inv = inv * (2.0 - denom * inv)                # one Newton step -> ~f32 accuracy
    o_ref[...] = (e * inv).astype(o_ref.dtype)


def policy_forward(x, w1_t, b1, w2_t, b2, *, tb=512):
    """x: (B, I) f32.  w1_t:(I,Hp) b1:(1,Hp) w2_t:(Hp,Op) b2:(1,Op) are the
    padded, pre-transposed params from pad_policy_params().

    Returns the padded (Bp, Op) probability slab:
      - rows [B:Bp] are padding (bias-only softmax rows), columns [O:Op] are
        exact zeros; slice/index lazily downstream (keeping the slice out of
        the hot path saves an XLA op that costs as much as the kernel here).
    Pick B so that B/tb >= 2 on v7x (keeps both TensorCores busy)."""
    B, I = x.shape
    Hp = w1_t.shape[1]
    Op = w2_t.shape[1]

    # Pad the batch up to a multiple of the batch tile.
    Bp = _round_up(max(B, tb), tb)
    if Bp != B:
        x = jnp.pad(x, ((0, Bp - B), (0, 0)))

    # Constant index_maps -> single-buffered, VMEM-resident parameters.
    resident = dict(pipeline_mode=pl.Buffered(1))

    out = pl.pallas_call(
        policy_kernel,
        out_shape=jax.ShapeDtypeStruct((Bp, Op), jnp.float32),
        grid_spec=pltpu.PrefetchScalarGridSpec(
            num_scalar_prefetch=0,
            grid=(Bp // tb,),
            in_specs=[
                pl.BlockSpec((tb, I), lambda i: (i, 0)),              # x: batch-tiled
                pl.BlockSpec((I, Hp), lambda i: (0, 0), **resident),  # W1^T resident
                pl.BlockSpec((1, Hp), lambda i: (0, 0), **resident),  # b1   resident
                pl.BlockSpec((Hp, Op), lambda i: (0, 0), **resident), # W2^T resident
                pl.BlockSpec((1, Op), lambda i: (0, 0), **resident),  # b2   resident
            ],
            out_specs=pl.BlockSpec((tb, Op), lambda i: (i, 0)),
        ),
        compiler_params=pltpu.CompilerParams(
            dimension_semantics=("parallel",)),       # 2-TC sharding on v7x
    )(x, w1_t, b1, w2_t, b2)

    return out


def init_policy_params(key, input_size, hidden_size, output_size):
    """Mirrors the PyTorch module init: weights ~ N(0, 0.1);
    biases ~ U(-1/sqrt(fan_in), 1/sqrt(fan_in)). Returns PyTorch-layout params."""
    k1, k2, k3, k4 = jax.random.split(key, 4)
    w1 = 0.1 * jax.random.normal(k1, (hidden_size, input_size), jnp.float32)
    w2 = 0.1 * jax.random.normal(k2, (output_size, hidden_size), jnp.float32)
    bound1 = 1.0 / jnp.sqrt(jnp.float32(input_size))
    bound2 = 1.0 / jnp.sqrt(jnp.float32(hidden_size))
    b1 = jax.random.uniform(k3, (hidden_size,), jnp.float32, -bound1, bound1)
    b2 = jax.random.uniform(k4, (output_size,), jnp.float32, -bound2, bound2)
    return w1, b1, w2, b2


def pad_policy_params(w1, b1, w2, b2):
    """Pre-transpose and pad to lane-dense (multiple-of-128) shapes (once per
    parameter set).  H zero-padding is exact: ReLU(0 + 0) = 0 feeds zero rows
    of W2^T.  Padded output lanes get bias -1e30 so softmax ignores them.
    The input feature dim I is intentionally NOT padded."""
    H, I = w1.shape
    O, _ = w2.shape
    Hp = _round_up(H, _LANE)
    Op = _round_up(O, _LANE)
    w1_t = jnp.zeros((I, Hp), jnp.float32).at[:, :H].set(w1.T)
    b1_p = jnp.zeros((1, Hp), jnp.float32).at[0, :H].set(b1)
    w2_t = jnp.zeros((Hp, Op), jnp.float32).at[:H, :O].set(w2.T)
    b2_p = jnp.full((1, Op), _NEG_BIG, jnp.float32).at[0, :O].set(b2)
    return w1_t, b1_p, w2_t, b2_p


if __name__ == "__main__":
    # REINFORCE-policy-sized layers; large batched rollout of states per call.
    INPUT, HIDDEN, OUTPUT = 16, 32, 4
    B = 1024     # many states per call (amortizes per-call + per-step overhead)
    TB = 512     # multiple of 256 (fills v6e/v7x MXU rows); grid = (2,) -> both v7x TCs busy

    key = jax.random.PRNGKey(0)
    kx, kp = jax.random.split(key)
    x = jax.random.normal(kx, (B, INPUT), jnp.float32)

    w1, b1, w2, b2 = init_policy_params(kp, INPUT, HIDDEN, OUTPUT)
    w1_t, b1_p, w2_t, b2_p = pad_policy_params(w1, b1, w2, b2)

    out_padded = policy_forward(x, w1_t, b1_p, w2_t, b2_p, tb=TB)
    out_padded = jax.block_until_ready(out_padded)

    # --- verification only (the hot path returns the padded slab unsliced) ---
    out = out_padded[:B, :OUTPUT]

    # Pure-JAX reference of the PyTorch forward (unpadded params).
    ref_h = jnp.maximum(x @ w1.T + b1, 0.0)
    ref = jax.nn.softmax(ref_h @ w2.T + b2, axis=1)

    assert out_padded.shape == (B, _round_up(OUTPUT, _LANE))
    assert jnp.allclose(out, ref, atol=1e-4, rtol=1e-4), \
        float(jnp.max(jnp.abs(out - ref)))
    assert jnp.allclose(jnp.sum(out, axis=1), 1.0, atol=1e-4)
    # Padded output lanes are exact zeros (so lane-lazy consumers stay correct).
    assert jnp.all(out_padded[:B, OUTPUT:] == 0.0)

    # TODO(synk): action sampling (Categorical) / log-prob gather could be fused
    # into the kernel with pltpu.prng_* to shrink the writeback at very large B.
    print("KERNEL_OK")
</pallas_src>

<mosaic_0001>
module attributes {stable_mosaic.version = 11 : i64} {
  func.func @policy_kernel(%arg0: i32, %arg1: memref<512x16xf32, #tpu.memory_space<vmem>>, %arg2: memref<16x128xf32, #tpu.memory_space<vmem>>, %arg3: memref<1x128xf32, #tpu.memory_space<vmem>>, %arg4: memref<128x128xf32, #tpu.memory_space<vmem>>, %arg5: memref<1x128xf32, #tpu.memory_space<vmem>>, %arg6: memref<512x128xf32, #tpu.memory_space<vmem>>) attributes {dimension_semantics = [#tpu.dimension_semantics<parallel>], iteration_bounds = array<i64: 2>, scalar_prefetch = 0 : i64, scratch_operands = 0 : i64, tpu.core_type = #tpu.core_type<tc>, window_params = [{transform_indices = @transform_0, window_bounds = array<i64: 512, 16>}, {pipeline_mode = #tpu.pipeline_mode<synchronous>, transform_indices = @transform_1, window_bounds = array<i64: 16, 128>}, {pipeline_mode = #tpu.pipeline_mode<synchronous>, transform_indices = @transform_2, window_bounds = array<i64: 1, 128>}, {pipeline_mode = #tpu.pipeline_mode<synchronous>, transform_indices = @transform_3, window_bounds = array<i64: 128, 128>}, {pipeline_mode = #tpu.pipeline_mode<synchronous>, transform_indices = @transform_4, window_bounds = array<i64: 1, 128>}, {transform_indices = @transform_5, window_bounds = array<i64: 512, 128>}]} {
    %c0 = arith.constant 0 : index
    %c0_0 = arith.constant 0 : index
    %0 = vector.load %arg1[%c0, %c0_0] : memref<512x16xf32, #tpu.memory_space<vmem>>, vector<512x16xf32>
    %c0_1 = arith.constant 0 : index
    %c0_2 = arith.constant 0 : index
    %1 = vector.load %arg2[%c0_1, %c0_2] : memref<16x128xf32, #tpu.memory_space<vmem>>, vector<16x128xf32>
    %cst = arith.constant dense<0.000000e+00> : vector<512x128xf32>
    %2 = tpu.matmul %0, %1, %cst {dimension_numbers = #tpu.dot_dimension_numbers<[1], [0], [0], [1], [0, 0, 1, 1], [], []>} : vector<512x16xf32>, vector<16x128xf32>, vector<512x128xf32> -> vector<512x128xf32>
    %c0_3 = arith.constant 0 : index
    %c0_4 = arith.constant 0 : index
    %3 = vector.load %arg3[%c0_3, %c0_4] : memref<1x128xf32, #tpu.memory_space<vmem>>, vector<1x128xf32>
    %4 = vector.broadcast %3 : vector<1x128xf32> to vector<512x128xf32>
    %5 = arith.addf %2, %4 : vector<512x128xf32>
    %cst_5 = arith.constant 0.000000e+00 : f32
    %6 = vector.broadcast %cst_5 : f32 to vector<512x128xf32>
    %7 = arith.maximumf %5, %6 : vector<512x128xf32>
    %c0_6 = arith.constant 0 : index
    %c0_7 = arith.constant 0 : index
    %8 = vector.load %arg4[%c0_6, %c0_7] : memref<128x128xf32, #tpu.memory_space<vmem>>, vector<128x128xf32>
    %cst_8 = arith.constant dense<0.000000e+00> : vector<512x128xf32>
    %9 = tpu.matmul %7, %8, %cst_8 {dimension_numbers = #tpu.dot_dimension_numbers<[1], [0], [0], [1], [0, 0, 1, 1], [], []>} : vector<512x128xf32>, vector<128x128xf32>, vector<512x128xf32> -> vector<512x128xf32>
    %c0_9 = arith.constant 0 : index
    %c0_10 = arith.constant 0 : index
    %10 = vector.load %arg5[%c0_9, %c0_10] : memref<1x128xf32, #tpu.memory_space<vmem>>, vector<1x128xf32>
    %11 = vector.broadcast %10 : vector<1x128xf32> to vector<512x128xf32>
    %12 = arith.addf %9, %11 : vector<512x128xf32>
    %cst_11 = arith.constant dense<0xFF800000> : vector<512xf32>
    %13 = vector.multi_reduction <maximumf>, %12, %cst_11 [1] : vector<512x128xf32> to vector<512xf32>
    %14 = vector.shape_cast %13 : vector<512xf32> to vector<512x1xf32>
    %15 = vector.broadcast %14 : vector<512x1xf32> to vector<512x128xf32>
    %16 = arith.subf %12, %15 : vector<512x128xf32>
    %17 = math.exp %16 : vector<512x128xf32>
    %cst_12 = arith.constant dense<0.000000e+00> : vector<512xf32>
    %18 = vector.multi_reduction <add>, %17, %cst_12 [1] : vector<512x128xf32> to vector<512xf32>
    %19 = vector.shape_cast %18 : vector<512xf32> to vector<512x1xf32>
    %20 = tpu.reciprocal %19 {approx = true} : vector<512x1xf32> -> vector<512x1xf32>
    %21 = arith.mulf %19, %20 : vector<512x1xf32>
    %cst_13 = arith.constant 2.000000e+00 : f32
    %22 = vector.broadcast %cst_13 : f32 to vector<512x1xf32>
    %23 = arith.subf %22, %21 : vector<512x1xf32>
    %24 = arith.mulf %20, %23 : vector<512x1xf32>
    %25 = vector.broadcast %24 : vector<512x1xf32> to vector<512x128xf32>
    %26 = arith.mulf %17, %25 : vector<512x128xf32>
    %c0_14 = arith.constant 0 : index
    %c0_15 = arith.constant 0 : index
    %27 = vector.load %arg6[%c0_14, %c0_15] : memref<512x128xf32, #tpu.memory_space<vmem>>, vector<512x128xf32>
    tpu.vector_store %arg6[%c0_14, %c0_15], %26 {strides = array<i32>} : memref<512x128xf32, #tpu.memory_space<vmem>>, vector<512x128xf32>,
    return
  }
  func.func @transform_0(%arg0: i32) -> (i32, i32) {
    %c0_i32 = arith.constant 0 : i32
    %c0_i32_0 = arith.constant 0 : i32
    return %arg0, %c0_i32 : i32, i32
  }
  func.func @transform_1(%arg0: i32) -> (i32, i32) {
    %c0_i32 = arith.constant 0 : i32
    %c0_i32_0 = arith.constant 0 : i32
    %c0_i32_1 = arith.constant 0 : i32
    return %c0_i32, %c0_i32_0 : i32, i32
  }
  func.func @transform_2(%arg0: i32) -> (i32, i32) {
    %c0_i32 = arith.constant 0 : i32
    %c0_i32_0 = arith.constant 0 : i32
    %c0_i32_1 = arith.constant 0 : i32
    return %c0_i32, %c0_i32_0 : i32, i32
  }
  func.func @transform_3(%arg0: i32) -> (i32, i32) {
    %c0_i32 = arith.constant 0 : i32
    %c0_i32_0 = arith.constant 0 : i32
    %c0_i32_1 = arith.constant 0 : i32
    return %c0_i32, %c0_i32_0 : i32, i32
  }
  func.func @transform_4(%arg0: i32) -> (i32, i32) {
    %c0_i32 = arith.constant 0 : i32
    %c0_i32_0 = arith.constant 0 : i32
    %c0_i32_1 = arith.constant 0 : i32
    return %c0_i32, %c0_i32_0 : i32, i32
  }
  func.func @transform_5(%arg0: i32) -> (i32, i32) {
    %c0_i32 = arith.constant 0 : i32
    %c0_i32_0 = arith.constant 0 : i32
    return %arg0, %c0_i32 : i32, i32
  }
}

</mosaic_0001>

<bundles_post_ra>
// kernel: tpu_custom_call.1
= control target key start
LH: loop header
LB: loop body
LE: loop exit
PB: predicated region body
PF: predicated region fallthrough
CT: control target
= control target key end

     0   :  { %10 = vsyncpa [#allocation3], 0  ;;  %s4163_s0 = inlined_call_operand.vmem [shape: f32[1024,16], index: 0, kind: input, shape index: {}]   ;;  %s4164_s1 = inlined_call_operand.vmem [shape: f32[16,128], index: 1, kind: input, shape index: {}]   ;;  %s4165_s2 = inlined_call_operand.vmem [shape: f32[1,128], index: 2, kind: input, shape index: {}]   ;;  %s4166_s3 = inlined_call_operand.vmem [shape: f32[128,128], index: 3, kind: input, shape index: {}]   ;;  %s4167_s4 = inlined_call_operand.vmem [shape: f32[1,128], index: 4, kind: input, shape index: {}]   ;;  %s4168_s5 = inlined_call_operand.hbm [shape: f32[1024,128], index: 5, kind: output, shape index: {}]  }
   0x1   :  { %12 = vsyncpa [#allocation3 + $0x1], 0  ;;  %s3156_s18 = smov 0   ;;  %s3158_s19 = smov 0  }
   0x2   :  { %s3160_s20 = smov 0   ;;  %s3162_s21 = smov 0  }
   0x3 LB: > { %s3177_s22 = sadd.s32 4294967295, %s3121_s21   ;;  %s2257_s23 = sadd.s32 4294967294, %s3121_s21   ;;  %s3121_s21 = sphi %s3162_s21, %s4282_s21   ;;  %s3117_s20 = sphi %s3160_s20, %s4281_s20   ;;  %s3113_s19 = sphi %s3158_s19, %s4280_s19   ;;  %s3109_s18 = sphi %s3156_s18, %s4279_s18  }
   0x4   : > { %s3181_s24 = sadd.s32 1, %s3121_s21   ;;  %s135_s25 = sadd.s32 1, %s3117_s20 }
   0x5   : > { %s132_s26 = ssub.s32 %s3121_s21, %s3181_s24  ;;  %p145_p0 = scmp.ne.s32.totalorder %s3117_s20, %s3113_s19 }
   0x6   : > { %p133_p1 = scmp.eq.s32.totalorder %s132_s26, 0  ;;  %p146_p2 = scmp.eq.s32.totalorder %s3177_s22, 1 }
   0x7   : > { %p151_p3 = scmp.ne.s32.totalorder %s3113_s19, %s3109_s18  ;;  %p152_p4 = scmp.eq.s32.totalorder %s2257_s23, 1 }
   0x8   : > { %s3192_s27 = scalar_select %p133_p1, %s3117_s20, %s135_s25  }
   0x9   : > { %p3194_p5 = por %p146_p2, %p145_p0  ;;  %p3198_p6 = por %p152_p4, %p151_p3 }
   0xa   : > { %p2260_p7 = scmp.ge.s32.totalorder %s3121_s21, 1  ;;  %p191_p8 = scmp.lt.s32.totalorder %s3121_s21, 3 }
   0xc   : > { %p192_p9 = pnand %p2260_p7, %p191_p8 }
   0xe   : > { %195 = sbr.rel (%p192_p9) target bundleno = 923 (0x39b), region = 40 }
  0x15   : > { %v290_v0 = vld [vmem:[%s4164_s1] sm:$0xff]  ;;  %v291_v1 = vld [vmem:[%s4164_s1 + $0x8] sm:$0xff]  ;;  %s2262_s9 = sshll.u32 %s3177_s22, 6  ;;  %v943_v5 = vld [vmem:[%s4166_s3 + $0x10] sm:$0xff]  ;;  %vm299_vm0 = vcmask 130048   ;;  %s2335_s6 = sshll.u32 %s3177_s22, 13 }
  0x16   : > { %v941_v2 = vld [vmem:[%s4166_s3] sm:$0xff]  ;;  %v2710_v3 = vpack.c.bf16 %v291_v1, %v290_v0  ;;  %p220_p10 = scmp.lt.s32.totalorder %s2262_s9, 127  ;;  %v942_v4 = vld [vmem:[%s4166_s3 + $0x8] sm:$0xff]  ;;  %v944_v6 = vld [vmem:[%s4166_s3 + $0x18] sm:$0xff]  ;;  %s3123_s12 = smov [#allocation2]  }
  0x17   : > { %v2714_v7 = vpack.c.bf16 %v942_v4, %v941_v2  ;;  %v2718_v8 = vpack.c.bf16 %v944_v6, %v943_v5  ;;  %v945_v9 = vld [vmem:[%s4166_s3 + $0x20] sm:$0xff]  ;;  %v946_v10 = vld [vmem:[%s4166_s3 + $0x28] sm:$0xff]  ;;  %v947_v16 = vld [vmem:[%s4166_s3 + $0x30] sm:$0xff]  ;;  %s3063_s13 = sshll.u32 %s3123_s12, 4  ;;  %s3064_s13 = int_to_ptr.vmem [resolvable:$false] %s3063_s13 }
  0x18   : > { %2711 = vmatprep.subr.bf16.mxu0 %v2710_v3  ;;  %s4284_s9 = smov (!%p220_p10, %s2262_s9), 127  ;;  %v2722_v14 = vpack.c.bf16 %v946_v10, %v945_v9  ;;  %v948_v17 = vld [vmem:[%s4166_s3 + $0x38] sm:$0xff]  ;;  %v949_v21 = vld [vmem:[%s4166_s3 + $0x40] sm:$0xff]  ;;  %v950_v22 = vld [vmem:[%s4166_s3 + $0x48] sm:$0xff]  ;;  %s3065_s14 = scalar_lea.vmem %s3064_s13, 16384 }
  0x19   : > { %2713 = vmatpush3.bf16.msra.mxu0 %v2710_v3  ;;  %2746 = vmatprep.subr.bf16.mxu1 %v2714_v7  ;;  %s2263_s23 = sshll.u32 %s4284_s9, 3  ;;  %v2726_v19 = vpack.c.bf16 %v948_v17, %v947_v16  ;;  %v2730_v24 = vpack.c.bf16 %v950_v22, %v949_v21  ;;  %v951_v26 = vld [vmem:[%s4166_s3 + $0x50] sm:$0xff]  ;;  %v952_v27 = vld [vmem:[%s4166_s3 + $0x58] sm:$0xff]  ;;  %v953_v34 = vld [vmem:[%s4166_s3 + $0x60] sm:$0xff]  ;;  %s4113_s9 = scalar_lea.hbm %s4168_s5, %s2335_s6 }
  0x1a   : > { %2715 = vmatprep.subr.bf16.mxu0 %v2714_v7  ;;  %2754 = vmatpush3.bf16.msra.mxu1 %v2714_v7  ;;  %s3226_s30 = scalar_lea.vmem %s4163_s0, %s2263_s23  ;;  %v2734_v29 = vpack.c.bf16 %v952_v27, %v951_v26  ;;  %v954_v35 = vld [vmem:[%s4166_s3 + $0x68] sm:$0xff]  ;;  %v955_v37 = vld [vmem:[%s4166_s3 + $0x70] sm:$0xff]  ;;  %v956_v38 = vld [vmem:[%s4166_s3 + $0x78] sm:$0xff]  ;;  %s216_s23 = sand.u32 1, %s3113_s19  }
  0x1b   : > { %2747 = vmatprep.subr.bf16.mxu1 %v2718_v8  ;;  %v226_v11 = vld [vmem:[%s3226_s30] sm:$0xff]  ;;  %v227_v12 = vld [vmem:[%s3226_s30 + $0x8] sm:$0xff]  ;;  %v228_v13 = vld [vmem:[%s3226_s30 + $0x10] sm:$0xff]  ;;  %v2738_v36 = vpack.c.bf16 %v954_v35, %v953_v34  ;;  %v2742_v41 = vpack.c.bf16 %v956_v38, %v955_v37  ;;  %s2261_s25 = sshll.u32 %s216_s23, 9  ;;  %s4122_s22 = scalar_lea.sflag [#allocation3], %s216_s23 }
  0x1c   : > { %2486 = vmatprep.mubr.msk.f32.mxu0 %vm299_vm0, %v226_v11  ;;  %v229_v15 = vld [vmem:[%s3226_s30 + $0x18] sm:$0xff]  ;;  %v230_v18 = vld [vmem:[%s3226_s30 + $0x20] sm:$0xff]  ;;  %v231_v20 = vld [vmem:[%s3226_s30 + $0x28] sm:$0xff]  ;;  %s3982_s26 = scalar_lea.vmem [#allocation2], %s2261_s25 }
  0x1d   : > { %2487 = vmatmul.mubr.msk.f32.vlgmr.msra.gmra.mrb[0].mxu0 %vm299_vm0, %v227_v12  ;;  %v232_v23 = vld [vmem:[%s3226_s30 + $0x30] sm:$0xff]  ;;  %v233_v25 = vld [vmem:[%s3226_s30 + $0x38] sm:$0xff]  ;;  %v234_v28 = vld [vmem:[%s3226_s30 + $0x40] sm:$0xff]  ;;  %s2195_s7 = sshll.u32 %s3982_s26, 4  ;;  %s4115_s7 = int_to_ptr.vmem [resolvable:$true] %s2195_s7 }
  0x1e   : > { %2755 = vmatpush3.bf16.msra.mxu1 %v2718_v8  ;;  %2489 = vmatprep.mubr.msk.f32.mxu0 %vm299_vm0, %v228_v13  ;;  %v235_v30 = vld [vmem:[%s3226_s30 + $0x48] sm:$0xff]  ;;  %v236_v31 = vld [vmem:[%s3226_s30 + $0x50] sm:$0xff]  ;;  %v237_v32 = vld [vmem:[%s3226_s30 + $0x58] sm:$0xff]  ;;  %s3059_s11 = scalar_lea.vmem %s4115_s7, 8192  ;;  %p3066_p0 = scmp.lt.s32.totalorder %s4115_s7, %s3064_s13 }
  0x1f   : > { %2717 = vmatpush3.bf16.msra.mxu0 %v2714_v7  ;;  %2748 = vmatprep.subr.bf16.mxu1 %v2722_v14  ;;  %v238_v33 = vld [vmem:[%s3226_s30 + $0x60] sm:$0xff]  ;;  %v239_v39 = vld [vmem:[%s3226_s30 + $0x68] sm:$0xff]  ;;  %v240_v40 = vld [vmem:[%s3226_s30 + $0x70] sm:$0xff]  ;;  %p3060_p11 = scmp.ne.s32.totalorder %s4115_s7, %s3059_s11  ;;  %p3067_p1 = scmp.lt.s32.totalorder %s3065_s14, %s3059_s11 }
  0x20   : > { %2719 = vmatprep.subr.bf16.mxu0 %v2718_v8  ;;  %v241_v42 = vld [vmem:[%s3226_s30 + $0x78] sm:$0xff]  ;;  %v242_v43 = vld [vmem:[%s3226_s30 + $0x80] sm:$0xff]  ;;  %v243_v44 = vld [vmem:[%s3226_s30 + $0x88] sm:$0xff] }
  0x21   : > { %2490 = vmatmul.mubr.msk.f32.gmra.mrb[2].mxu0 %vm299_vm0, %v229_v15  ;;  %v244_v45 = vld [vmem:[%s3226_s30 + $0x90] sm:$0xff]  ;;  %v245_v46 = vld [vmem:[%s3226_s30 + $0x98] sm:$0xff]  ;;  %v246_v47 = vld [vmem:[%s3226_s30 + $0xa0] sm:$0xff]  ;;  %p3061_p12 = pnand %p3060_p11, %p3194_p5  ;;  %p3068_p2 = por %p3067_p1, %p3066_p0 }
  0x22   : > { %2756 = vmatpush3.bf16.msra.mxu1 %v2722_v14  ;;  %2492 = vmatprep.mubr.msk.f32.mxu0 %vm299_vm0, %v230_v18  ;;  %v247_v48 = vld [vmem:[%s3226_s30 + $0xa8] sm:$0xff]  ;;  %v248_v49 = vld [vmem:[%s3226_s30 + $0xb0] sm:$0xff]  ;;  %v249_v50 = vld [vmem:[%s3226_s30 + $0xb8] sm:$0xff] }
  0x23   : > { %2721 = vmatpush3.bf16.msra.mxu0 %v2718_v8  ;;  %2749 = vmatprep.subr.bf16.mxu1 %v2726_v19  ;;  %v250_v51 = vld [vmem:[%s3226_s30 + $0xc0] sm:$0xff]  ;;  %v251_v52 = vld [vmem:[%s3226_s30 + $0xc8] sm:$0xff]  ;;  %v252_v53 = vld [vmem:[%s3226_s30 + $0xd0] sm:$0xff]  ;;  %p3062_p13 = pneg %p3061_p12 }
  0x24   : > { %2723 = vmatprep.subr.bf16.mxu0 %v2722_v14  ;;  %v253_v54 = vld [vmem:[%s3226_s30 + $0xd8] sm:$0xff]  ;;  %v254_v55 = vld [vmem:[%s3226_s30 + $0xe0] sm:$0xff]  ;;  %v255_v56 = vld [vmem:[%s3226_s30 + $0xe8] sm:$0xff] }
  0x25   : > { %2493 = vmatmul.mubr.msk.f32.gmra.mrb[4].mxu0 %vm299_vm0, %v231_v20  ;;  %v256_v57 = vld [vmem:[%s3226_s30 + $0xf0] sm:$0xff]  ;;  %v257_v58 = vld [vmem:[%s3226_s30 + $0xf8] sm:$0xff]  ;;  %v258_v59 = vld [vmem:[%s3226_s30 + $0x100] sm:$0xff]  ;;  %p3069_p3 = pnand %p3068_p2, %p3062_p13 }
  0x26   : > { %2757 = vmatpush3.bf16.msra.mxu1 %v2726_v19  ;;  %2495 = vmatprep.mubr.msk.f32.mxu0 %vm299_vm0, %v232_v23  ;;  %v259_v60 = vld [vmem:[%s3226_s30 + $0x108] sm:$0xff]  ;;  %v260_v61 = vld [vmem:[%s3226_s30 + $0x110] sm:$0xff]  ;;  %v261_v62 = vld [vmem:[%s3226_s30 + $0x118] sm:$0xff] }
  0x27   : > { %2725 = vmatpush3.bf16.msra.mxu0 %v2722_v14  ;;  %2750 = vmatprep.subr.bf16.mxu1 %v2730_v24  ;;  %v262_v63 = vld [vmem:[%s3226_s30 + $0x120] sm:$0xff]  ;;  %v263_v0 = vld [vmem:[%s3226_s30 + $0x128] sm:$0xff]  ;;  %v264_v1 = vld [vmem:[%s3226_s30 + $0x130] sm:$0xff] }
  0x28   : > { %2727 = vmatprep.subr.bf16.mxu0 %v2726_v19  ;;  %v265_v2 = vld [vmem:[%s3226_s30 + $0x138] sm:$0xff]  ;;  %v266_v3 = vld [vmem:[%s3226_s30 + $0x140] sm:$0xff]  ;;  %v267_v4 = vld [vmem:[%s3226_s30 + $0x148] sm:$0xff] }
  0x29   : > { %2496 = vmatmul.mubr.msk.f32.gmra.mrb[6].mxu0 %vm299_vm0, %v233_v25  ;;  %v268_v5 = vld [vmem:[%s3226_s30 + $0x150] sm:$0xff]  ;;  %v269_v6 = vld [vmem:[%s3226_s30 + $0x158] sm:$0xff]  ;;  %v270_v7 = vld [vmem:[%s3226_s30 + $0x160] sm:$0xff] }
  0x2a   : > { %2758 = vmatpush3.bf16.msra.mxu1 %v2730_v24  ;;  %2498 = vmatprep.mubr.msk.f32.mxu0 %vm299_vm0, %v234_v28  ;;  %v271_v8 = vld [vmem:[%s3226_s30 + $0x168] sm:$0xff]  ;;  %v272_v9 = vld [vmem:[%s3226_s30 + $0x170] sm:$0xff]  ;;  %v273_v10 = vld [vmem:[%s3226_s30 + $0x178] sm:$0xff] }
  0x2b   : > { %2729 = vmatpush3.bf16.msra.mxu0 %v2726_v19  ;;  %2751 = vmatprep.subr.bf16.mxu1 %v2734_v29  ;;  %v274_v11 = vld [vmem:[%s3226_s30 + $0x180] sm:$0xff]  ;;  %v275_v12 = vld [vmem:[%s3226_s30 + $0x188] sm:$0xff]  ;;  %v276_v13 = vld [vmem:[%s3226_s30 + $0x190] sm:$0xff] }
  0x2c   : > { %2731 = vmatprep.subr.bf16.mxu0 %v2730_v24  ;;  %v277_v14 = vld [vmem:[%s3226_s30 + $0x198] sm:$0xff]  ;;  %v278_v15 = vld [vmem:[%s3226_s30 + $0x1a0] sm:$0xff]  ;;  %v279_v16 = vld [vmem:[%s3226_s30 + $0x1a8] sm:$0xff] }
  0x2d   : > { %2499 = vmatmul.mubr.msk.f32.gmra.mrb[8].mxu0 %vm299_vm0, %v235_v30  ;;  %v280_v17 = vld [vmem:[%s3226_s30 + $0x1b0] sm:$0xff]  ;;  %v281_v18 = vld [vmem:[%s3226_s30 + $0x1b8] sm:$0xff]  ;;  %v282_v19 = vld [vmem:[%s3226_s30 + $0x1c0] sm:$0xff] }
  0x2e   : > { %2759 = vmatpush3.bf16.msra.mxu1 %v2734_v29  ;;  %2501 = vmatprep.mubr.msk.f32.mxu0 %vm299_vm0, %v236_v31  ;;  %v283_v20 = vld [vmem:[%s3226_s30 + $0x1c8] sm:$0xff]  ;;  %v284_v21 = vld [vmem:[%s3226_s30 + $0x1d0] sm:$0xff]  ;;  %v285_v22 = vld [vmem:[%s3226_s30 + $0x1d8] sm:$0xff] }
  0x2f   : > { %2733 = vmatpush3.bf16.msra.mxu0 %v2730_v24  ;;  %2752 = vmatprep.subr.bf16.mxu1 %v2738_v36  ;;  %v286_v23 = vld [vmem:[%s3226_s30 + $0x1e0] sm:$0xff]  ;;  %v287_v24 = vld [vmem:[%s3226_s30 + $0x1e8] sm:$0xff]  ;;  %v288_v25 = vld [vmem:[%s3226_s30 + $0x1f0] sm:$0xff] }
  0x30   : > { %2735 = vmatprep.subr.bf16.mxu0 %v2734_v29  ;;  %v289_v26 = vld [vmem:[%s3226_s30 + $0x1f8] sm:$0xff]  ;;  %v3395_v27 = vld [vmem:[%s4165_s2] ss:$0 sm:$0xff] }
  0x31   : > { %2502 = vmatmul.mubr.msk.f32.gmra.mrb[10].mxu0 %vm299_vm0, %v237_v32 }
  0x32   : > { %2504 = vmatprep.mubr.msk.f32.mxu0 %vm299_vm0, %v238_v33  ;;  %2760 = vmatpush3.bf16.msra.mxu1 %v2738_v36 }
  0x33   : > { %2737 = vmatpush3.bf16.msra.mxu0 %v2734_v29  ;;  %2753 = vmatprep.subr.bf16.mxu1 %v2742_v41 }
  0x34   : > { %2739 = vmatprep.subr.bf16.mxu0 %v2738_v36 }
  0x35   : > { %2505 = vmatmul.mubr.msk.f32.gmra.mrb[12].mxu0 %vm299_vm0, %v239_v39 }
  0x36   : > { %2507 = vmatprep.mubr.msk.f32.mxu0 %vm299_vm0, %v240_v40  ;;  %2761 = vmatpush3.bf16.msra.mxu1 %v2742_v41 }
  0x37   : > { %2741 = vmatpush3.bf16.msra.mxu0 %v2738_v36 }
  0x38   : > { %2743 = vmatprep.subr.bf16.mxu0 %v2742_v41 }
  0x39   : > { %2508 = vmatmul.mubr.msk.f32.gmra.mrb[14].mxu0 %vm299_vm0, %v241_v42 }
  0x3a   : > { %2510 = vmatprep.mubr.msk.f32.mxu0 %vm299_vm0, %v242_v43 }
  0x3b   : > { %2745 = vmatpush3.bf16.msra.mxu0 %v2742_v41 }
  0x3d   : > { %2511 = vmatmul.mubr.msk.f32.gmra.mrb[16].mxu0 %vm299_vm0, %v243_v44 }
  0x3e   : > { %2513 = vmatprep.mubr.msk.f32.mxu0 %vm299_vm0, %v244_v45 }
  0x41   : > { %2514 = vmatmul.mubr.msk.f32.gmra.mrb[18].mxu0 %vm299_vm0, %v245_v46 }
  0x42   : > { %2516 = vmatprep.mubr.msk.f32.mxu0 %vm299_vm0, %v246_v47 }
  0x45   : > { %2517 = vmatmul.mubr.msk.f32.gmra.mrb[20].mxu0 %vm299_vm0, %v247_v48 }
  0x46   : > { %2519 = vmatprep.mubr.msk.f32.mxu0 %vm299_vm0, %v248_v49 }
  0x49   : > { %2520 = vmatmul.mubr.msk.f32.gmra.mrb[22].mxu0 %vm299_vm0, %v249_v50 }
  0x4a   : > { %2522 = vmatprep.mubr.msk.f32.mxu0 %vm299_vm0, %v250_v51 }
  0x4d   : > { %2523 = vmatmul.mubr.msk.f32.gmra.mrb[24].mxu0 %vm299_vm0, %v251_v52 }
  0x4e   : > { %2525 = vmatprep.mubr.msk.f32.mxu0 %vm299_vm0, %v252_v53 }
  0x51   : > { %2526 = vmatmul.mubr.msk.f32.gmra.mrb[26].mxu0 %vm299_vm0, %v253_v54 }
  0x52   : > { %2528 = vmatprep.mubr.msk.f32.mxu0 %vm299_vm0, %v254_v55 }
  0x55   : > { %2529 = vmatmul.mubr.msk.f32.gmra.mrb[28].mxu0 %vm299_vm0, %v255_v56 }
  0x56   : > { %2531 = vmatprep.mubr.msk.f32.mxu0 %vm299_vm0, %v256_v57 }
  0x59   : > { %2532 = vmatmul.mubr.msk.f32.gmra.mrb[30].mxu0 %vm299_vm0, %v257_v58 }
  0x5a   : > { %2534 = vmatprep.mubr.msk.f32.mxu0 %vm299_vm0, %v258_v59 }
  0x5d   : > { %2535 = vmatmul.mubr.msk.f32.gmra.mrb[32].mxu0 %vm299_vm0, %v259_v60 }
  0x5e   : > { %2537 = vmatprep.mubr.msk.f32.mxu0 %vm299_vm0, %v260_v61 }
  0x61   : > { %2538 = vmatmul.mubr.msk.f32.gmra.mrb[34].mxu0 %vm299_vm0, %v261_v62 }
  0x62   : > { %2540 = vmatprep.mubr.msk.f32.mxu0 %vm299_vm0, %v262_v63 }
  0x65   : > { %2541 = vmatmul.mubr.msk.f32.gmra.mrb[36].mxu0 %vm299_vm0, %v263_v0 }
  0x66   : > { %2543 = vmatprep.mubr.msk.f32.mxu0 %vm299_vm0, %v264_v1 }
  0x69   : > { %2544 = vmatmul.mubr.msk.f32.gmra.mrb[38].mxu0 %vm299_vm0, %v265_v2 }
  0x6a   : > { %2546 = vmatprep.mubr.msk.f32.mxu0 %vm299_vm0, %v266_v3 }
  0x6d   : > { %2547 = vmatmul.mubr.msk.f32.gmra.mrb[40].mxu0 %vm299_vm0, %v267_v4 }
  0x6e   : > { %2549 = vmatprep.mubr.msk.f32.mxu0 %vm299_vm0, %v268_v5 }
  0x71   : > { %2550 = vmatmul.mubr.msk.f32.gmra.mrb[42].mxu0 %vm299_vm0, %v269_v6 }
  0x72   : > { %2552 = vmatprep.mubr.msk.f32.mxu0 %vm299_vm0, %v270_v7 }
  0x75   : > { %2553 = vmatmul.mubr.msk.f32.gmra.mrb[44].mxu0 %vm299_vm0, %v271_v8 }
  0x76   : > { %2555 = vmatprep.mubr.msk.f32.mxu0 %vm299_vm0, %v272_v9 }
  0x79   : > { %2556 = vmatmul.mubr.msk.f32.gmra.mrb[46].mxu0 %vm299_vm0, %v273_v10 }
  0x7a   : > { %2558 = vmatprep.mubr.msk.f32.mxu0 %vm299_vm0, %v274_v11 }
  0x7d   : > { %2559 = vmatmul.mubr.msk.f32.gmra.mrb[48].mxu0 %vm299_vm0, %v275_v12 }
  0x7e   : > { %2561 = vmatprep.mubr.msk.f32.mxu0 %vm299_vm0, %v276_v13 }
  0x81   : > { %2562 = vmatmul.mubr.msk.f32.gmra.mrb[50].mxu0 %vm299_vm0, %v277_v14 }
  0x82   : > { %2564 = vmatprep.mubr.msk.f32.mxu0 %vm299_vm0, %v278_v15 }
  0x85   : > { %2565 = vmatmul.mubr.msk.f32.gmra.mrb[52].mxu0 %vm299_vm0, %v279_v16 }
  0x86   : > { %2567 = vmatprep.mubr.msk.f32.mxu0 %vm299_vm0, %v280_v17 }
  0x89   : > { %2568 = vmatmul.mubr.msk.f32.gmra.mrb[54].mxu0 %vm299_vm0, %v281_v18 }
  0x8a   : > { %2570 = vmatprep.mubr.msk.f32.mxu0 %vm299_vm0, %v282_v19 }
  0x8d   : > { %2571 = vmatmul.mubr.msk.f32.gmra.mrb[56].mxu0 %vm299_vm0, %v283_v20 }
  0x8e   : > { %2573 = vmatprep.mubr.msk.f32.mxu0 %vm299_vm0, %v284_v21 }
  0x91   : > { %2574 = vmatmul.mubr.msk.f32.gmra.mrb[58].mxu0 %vm299_vm0, %v285_v22 }
  0x92   : > { %2576 = vmatprep.mubr.msk.f32.mxu0 %vm299_vm0, %v286_v23 }
  0x95   : > { %2577 = vmatmul.mubr.msk.f32.gmra.mrb[60].mxu0 %vm299_vm0, %v287_v24 }
  0x96   : > { %2579 = vmatprep.mubr.msk.f32.mxu0 %vm299_vm0, %v288_v25 }
  0x99   : > { %2580 = vmatmul.mubr.msk.f32.gmra.mrb[62].mxu0 %vm299_vm0, %v289_v26 }
  0xf0   : > { %v2488_v28 = vpop.f32.mrb[0].mxu0 }
  0xf1   : > { %v564_v29 = vadd.f32 %v2488_v28, %v3395_v27  ;;  %v558_v30 = vpop.f32.mrb[1].mxu0 }
  0xf2   : > { %v559_v31 = vadd.f32 %v3395_v27, %v558_v30 }
  0xf3   : > { %v878_v34 = vmax.f32 %v564_v29, 0.0 }
  0xf4   : > { %v877_v32 = vmax.f32 %v559_v31, 0.0  ;;  %v2491_v33 = vpop.f32.mrb[2].mxu0 }
  0xf5   : > { %v574_v35 = vadd.f32 %v2491_v33, %v3395_v27  ;;  %v568_v36 = vpop.f32.mrb[3].mxu0 }
  0xf6   : > { %v569_v37 = vadd.f32 %v3395_v27, %v568_v36  ;;  %2614 = vmatprep.mubr.f32.mxu0 %v877_v32 }
  0xf7   : > { %2615 = vmatmul.mubr.f32.vlgmr.msra.gmra.mrb[64].mxu0 %v878_v34  ;;  %v880_v40 = vmax.f32 %v574_v35, 0.0 }
  0xf8   : > { %v879_v38 = vmax.f32 %v569_v37, 0.0  ;;  %v2494_v39 = vpop.f32.mrb[4].mxu0 }
  0xf9   : > { %v584_v41 = vadd.f32 %v2494_v39, %v3395_v27  ;;  %v578_v42 = vpop.f32.mrb[5].mxu0 }
  0xfa   : > { %v579_v43 = vadd.f32 %v3395_v27, %v578_v42  ;;  %2617 = vmatprep.mubr.f32.mxu0 %v879_v38 }
  0xfb   : > { %v882_v44 = vmax.f32 %v584_v41, 0.0  ;;  %2618 = vmatmul.mubr.f32.gmra.mrb[66].mxu0 %v880_v40 }
  0xfc   : > { %v881_v45 = vmax.f32 %v579_v43, 0.0  ;;  %v2497_v46 = vpop.f32.mrb[6].mxu0 }
  0xfd   : > { %v594_v47 = vadd.f32 %v2497_v46, %v3395_v27  ;;  %v588_v48 = vpop.f32.mrb[7].mxu0 }
  0xfe   : > { %2620 = vmatprep.mubr.f32.mxu0 %v881_v45  ;;  %v589_v49 = vadd.f32 %v3395_v27, %v588_v48 }
  0xff   : > { %v884_v50 = vmax.f32 %v594_v47, 0.0  ;;  %2621 = vmatmul.mubr.f32.gmra.mrb[68].mxu0 %v882_v44 }
 0x100   : > { %v2500_v51 = vpop.f32.mrb[8].mxu0  ;;  %v883_v52 = vmax.f32 %v589_v49, 0.0 }
 0x101   : > { %v604_v53 = vadd.f32 %v2500_v51, %v3395_v27  ;;  %v598_v54 = vpop.f32.mrb[9].mxu0 }
 0x102   : > { %v599_v55 = vadd.f32 %v3395_v27, %v598_v54  ;;  %2623 = vmatprep.mubr.f32.mxu1 %v883_v52 }
 0x103   : > { %v886_v56 = vmax.f32 %v604_v53, 0.0  ;;  %2624 = vmatmul.mubr.f32.vlgmr.msra.gmra.mrb[0].mxu1 %v884_v50 }
 0x104   : > { %v885_v57 = vmax.f32 %v599_v55, 0.0  ;;  %v2503_v58 = vpop.f32.mrb[10].mxu0 }
 0x105   : > { %v614_v59 = vadd.f32 %v2503_v58, %v3395_v27  ;;  %v608_v60 = vpop.f32.mrb[11].mxu0 }
 0x106   : > { %v609_v61 = vadd.f32 %v3395_v27, %v608_v60  ;;  %2626 = vmatprep.mubr.f32.mxu1 %v885_v57 }
 0x107   : > { %v888_v62 = vmax.f32 %v614_v59, 0.0  ;;  %2627 = vmatmul.mubr.f32.gmra.mrb[2].mxu1 %v886_v56 }
 0x108   : > { %v887_v63 = vmax.f32 %v609_v61, 0.0  ;;  %v2506_v0 = vpop.f32.mrb[12].mxu0 }
 0x109   : > { %v624_v1 = vadd.f32 %v2506_v0, %v3395_v27  ;;  %v618_v2 = vpop.f32.mrb[13].mxu0 }
 0x10a   : > { %v619_v3 = vadd.f32 %v3395_v27, %v618_v2  ;;  %2629 = vmatprep.mubr.f32.mxu1 %v887_v63 }
 0x10b   : > { %v890_v4 = vmax.f32 %v624_v1, 0.0  ;;  %2630 = vmatmul.mubr.f32.gmra.mrb[4].mxu1 %v888_v62 }
 0x10c   : > { %v889_v5 = vmax.f32 %v619_v3, 0.0  ;;  %v2509_v6 = vpop.f32.mrb[14].mxu0 }
 0x10d   : > { %v634_v7 = vadd.f32 %v2509_v6, %v3395_v27  ;;  %v628_v8 = vpop.f32.mrb[15].mxu0 }
 0x10e   : > { %v629_v9 = vadd.f32 %v3395_v27, %v628_v8  ;;  %2632 = vmatprep.mubr.f32.mxu1 %v889_v5 }
 0x10f   : > { %v892_v10 = vmax.f32 %v634_v7, 0.0  ;;  %2633 = vmatmul.mubr.f32.gmra.mrb[6].mxu1 %v890_v4 }
 0x110   : > { %v891_v11 = vmax.f32 %v629_v9, 0.0  ;;  %v2512_v12 = vpop.f32.mrb[16].mxu0 }
 0x111   : > { %v644_v13 = vadd.f32 %v2512_v12, %v3395_v27  ;;  %v638_v14 = vpop.f32.mrb[17].mxu0 }
 0x112   : > { %v639_v15 = vadd.f32 %v3395_v27, %v638_v14  ;;  %2635 = vmatprep.mubr.f32.mxu1 %v891_v11 }
 0x113   : > { %v894_v16 = vmax.f32 %v644_v13, 0.0  ;;  %2636 = vmatmul.mubr.f32.gmra.mrb[8].mxu1 %v892_v10 }
 0x114   : > { %v893_v17 = vmax.f32 %v639_v15, 0.0  ;;  %v2515_v18 = vpop.f32.mrb[18].mxu0 }
 0x115   : > { %v654_v19 = vadd.f32 %v2515_v18, %v3395_v27  ;;  %v648_v20 = vpop.f32.mrb[19].mxu0 }
 0x116   : > { %v649_v21 = vadd.f32 %v3395_v27, %v648_v20  ;;  %2638 = vmatprep.mubr.f32.mxu1 %v893_v17 }
 0x117   : > { %v896_v22 = vmax.f32 %v654_v19, 0.0  ;;  %2639 = vmatmul.mubr.f32.gmra.mrb[10].mxu1 %v894_v16 }
 0x118   : > { %v895_v23 = vmax.f32 %v649_v21, 0.0  ;;  %v2518_v24 = vpop.f32.mrb[20].mxu0 }
 0x119   : > { %v664_v25 = vadd.f32 %v2518_v24, %v3395_v27  ;;  %v658_v26 = vpop.f32.mrb[21].mxu0 }
 0x11a   : > { %v659_v28 = vadd.f32 %v3395_v27, %v658_v26  ;;  %2641 = vmatprep.mubr.f32.mxu1 %v895_v23 }
 0x11b   : > { %v898_v29 = vmax.f32 %v664_v25, 0.0  ;;  %2642 = vmatmul.mubr.f32.gmra.mrb[12].mxu1 %v896_v22 }
 0x11c   : > { %v897_v30 = vmax.f32 %v659_v28, 0.0  ;;  %v2521_v31 = vpop.f32.mrb[22].mxu0 }
 0x11d   : > { %v674_v32 = vadd.f32 %v2521_v31, %v3395_v27  ;;  %v668_v33 = vpop.f32.mrb[23].mxu0 }
 0x11e   : > { %v669_v34 = vadd.f32 %v3395_v27, %v668_v33  ;;  %2644 = vmatprep.mubr.f32.mxu1 %v897_v30 }
 0x11f   : > { %v900_v35 = vmax.f32 %v674_v32, 0.0  ;;  %2645 = vmatmul.mubr.f32.gmra.mrb[14].mxu1 %v898_v29 }
 0x120   : > { %v899_v36 = vmax.f32 %v669_v34, 0.0  ;;  %v2524_v37 = vpop.f32.mrb[24].mxu0 }
 0x121   : > { %v684_v38 = vadd.f32 %v2524_v37, %v3395_v27  ;;  %v678_v39 = vpop.f32.mrb[25].mxu0 }
 0x122   : > { %v679_v40 = vadd.f32 %v3395_v27, %v678_v39  ;;  %2647 = vmatprep.mubr.f32.mxu1 %v899_v36 }
 0x123   : > { %v902_v41 = vmax.f32 %v684_v38, 0.0  ;;  %2648 = vmatmul.mubr.f32.gmra.mrb[16].mxu1 %v900_v35 }
 0x124   : > { %v901_v42 = vmax.f32 %v679_v40, 0.0  ;;  %v2527_v43 = vpop.f32.mrb[26].mxu0 }
 0x125   : > { %v694_v44 = vadd.f32 %v2527_v43, %v3395_v27  ;;  %v688_v45 = vpop.f32.mrb[27].mxu0 }
 0x126   : > { %v689_v46 = vadd.f32 %v3395_v27, %v688_v45  ;;  %2650 = vmatprep.mubr.f32.mxu1 %v901_v42 }
 0x127   : > { %v904_v47 = vmax.f32 %v694_v44, 0.0  ;;  %2651 = vmatmul.mubr.f32.gmra.mrb[18].mxu1 %v902_v41 }
 0x128   : > { %v903_v48 = vmax.f32 %v689_v46, 0.0  ;;  %v2530_v49 = vpop.f32.mrb[28].mxu0 }
 0x129   : > { %v704_v50 = vadd.f32 %v2530_v49, %v3395_v27  ;;  %v698_v51 = vpop.f32.mrb[29].mxu0 }
 0x12a   : > { %v699_v52 = vadd.f32 %v3395_v27, %v698_v51  ;;  %2653 = vmatprep.mubr.f32.mxu1 %v903_v48 }
 0x12b   : > { %v906_v53 = vmax.f32 %v704_v50, 0.0  ;;  %2654 = vmatmul.mubr.f32.gmra.mrb[20].mxu1 %v904_v47 }
 0x12c   : > { %v905_v54 = vmax.f32 %v699_v52, 0.0  ;;  %v2533_v55 = vpop.f32.mrb[30].mxu0 }
 0x12d   : > { %v714_v56 = vadd.f32 %v2533_v55, %v3395_v27  ;;  %v708_v57 = vpop.f32.mrb[31].mxu0 }
 0x12e   : > { %v709_v58 = vadd.f32 %v3395_v27, %v708_v57  ;;  %2656 = vmatprep.mubr.f32.mxu1 %v905_v54 }
 0x12f   : > { %v908_v59 = vmax.f32 %v714_v56, 0.0  ;;  %2657 = vmatmul.mubr.f32.gmra.mrb[22].mxu1 %v906_v53 }
 0x130   : > { %v907_v60 = vmax.f32 %v709_v58, 0.0  ;;  %v2536_v61 = vpop.f32.mrb[32].mxu0 }
 0x131   : > { %v724_v62 = vadd.f32 %v2536_v61, %v3395_v27  ;;  %v718_v63 = vpop.f32.mrb[33].mxu0 }
 0x132   : > { %v719_v0 = vadd.f32 %v3395_v27, %v718_v63  ;;  %2659 = vmatprep.mubr.f32.mxu1 %v907_v60 }
 0x133   : > { %v910_v1 = vmax.f32 %v724_v62, 0.0  ;;  %2660 = vmatmul.mubr.f32.gmra.mrb[24].mxu1 %v908_v59 }
 0x134   : > { %v909_v2 = vmax.f32 %v719_v0, 0.0  ;;  %v2539_v3 = vpop.f32.mrb[34].mxu0 }
 0x135   : > { %v734_v4 = vadd.f32 %v2539_v3, %v3395_v27  ;;  %v728_v5 = vpop.f32.mrb[35].mxu0 }
 0x136   : > { %v729_v6 = vadd.f32 %v3395_v27, %v728_v5  ;;  %2662 = vmatprep.mubr.f32.mxu1 %v909_v2 }
 0x137   : > { %v912_v7 = vmax.f32 %v734_v4, 0.0  ;;  %2663 = vmatmul.mubr.f32.gmra.mrb[26].mxu1 %v910_v1 }
 0x138   : > { %v911_v8 = vmax.f32 %v729_v6, 0.0  ;;  %v2542_v9 = vpop.f32.mrb[36].mxu0 }
 0x139   : > { %v744_v10 = vadd.f32 %v2542_v9, %v3395_v27  ;;  %v738_v11 = vpop.f32.mrb[37].mxu0 }
 0x13a   : > { %v739_v12 = vadd.f32 %v3395_v27, %v738_v11  ;;  %2665 = vmatprep.mubr.f32.mxu1 %v911_v8 }
 0x13b   : > { %v914_v13 = vmax.f32 %v744_v10, 0.0  ;;  %2666 = vmatmul.mubr.f32.gmra.mrb[28].mxu1 %v912_v7 }
 0x13c   : > { %v913_v14 = vmax.f32 %v739_v12, 0.0  ;;  %v2545_v15 = vpop.f32.mrb[38].mxu0 }
 0x13d   : > { %v754_v16 = vadd.f32 %v2545_v15, %v3395_v27  ;;  %v748_v17 = vpop.f32.mrb[39].mxu0 }
 0x13e   : > { %v749_v18 = vadd.f32 %v3395_v27, %v748_v17  ;;  %2668 = vmatprep.mubr.f32.mxu1 %v913_v14 }
 0x13f   : > { %v916_v19 = vmax.f32 %v754_v16, 0.0  ;;  %2669 = vmatmul.mubr.f32.gmra.mrb[30].mxu1 %v914_v13 }
 0x140   : > { %v915_v20 = vmax.f32 %v749_v18, 0.0  ;;  %v2548_v21 = vpop.f32.mrb[40].mxu0 }
 0x141   : > { %v764_v22 = vadd.f32 %v2548_v21, %v3395_v27  ;;  %v758_v23 = vpop.f32.mrb[41].mxu0 }
 0x142   : > { %v759_v24 = vadd.f32 %v3395_v27, %v758_v23  ;;  %2671 = vmatprep.mubr.f32.mxu1 %v915_v20 }
 0x143   : > { %v918_v25 = vmax.f32 %v764_v22, 0.0  ;;  %2672 = vmatmul.mubr.f32.gmra.mrb[32].mxu1 %v916_v19 }
 0x144   : > { %v917_v26 = vmax.f32 %v759_v24, 0.0  ;;  %v2551_v28 = vpop.f32.mrb[42].mxu0 }
 0x145   : > { %v774_v29 = vadd.f32 %v2551_v28, %v3395_v27  ;;  %v768_v30 = vpop.f32.mrb[43].mxu0 }
 0x146   : > { %v769_v31 = vadd.f32 %v3395_v27, %v768_v30  ;;  %2674 = vmatprep.mubr.f32.mxu1 %v917_v26 }
 0x147   : > { %v920_v32 = vmax.f32 %v774_v29, 0.0  ;;  %2675 = vmatmul.mubr.f32.gmra.mrb[34].mxu1 %v918_v25 }
 0x148   : > { %v919_v33 = vmax.f32 %v769_v31, 0.0  ;;  %v2554_v34 = vpop.f32.mrb[44].mxu0  ;;  %v3464_v31 = vld [vmem:[%s4167_s4] ss:$0 sm:$0xff] }
 0x149   : > { %v784_v35 = vadd.f32 %v2554_v34, %v3395_v27  ;;  %v778_v36 = vpop.f32.mrb[45].mxu0 }
 0x14a   : > { %v779_v37 = vadd.f32 %v3395_v27, %v778_v36  ;;  %2677 = vmatprep.mubr.f32.mxu1 %v919_v33 }
 0x14b   : > { %v922_v38 = vmax.f32 %v784_v35, 0.0  ;;  %2678 = vmatmul.mubr.f32.gmra.mrb[36].mxu1 %v920_v32 }
 0x14c   : > { %v921_v39 = vmax.f32 %v779_v37, 0.0  ;;  %v2557_v40 = vpop.f32.mrb[46].mxu0 }
 0x14d   : > { %v794_v41 = vadd.f32 %v2557_v40, %v3395_v27  ;;  %v788_v42 = vpop.f32.mrb[47].mxu0 }
 0x14e   : > { %v789_v43 = vadd.f32 %v3395_v27, %v788_v42  ;;  %2680 = vmatprep.mubr.f32.mxu1 %v921_v39 }
 0x14f   : > { %v924_v44 = vmax.f32 %v794_v41, 0.0  ;;  %2681 = vmatmul.mubr.f32.gmra.mrb[38].mxu1 %v922_v38 }
 0x150   : > { %v923_v45 = vmax.f32 %v789_v43, 0.0  ;;  %v2560_v46 = vpop.f32.mrb[48].mxu0 }
 0x151   : > { %v804_v47 = vadd.f32 %v2560_v46, %v3395_v27  ;;  %v798_v48 = vpop.f32.mrb[49].mxu0 }
 0x152   : > { %v799_v49 = vadd.f32 %v3395_v27, %v798_v48  ;;  %2683 = vmatprep.mubr.f32.mxu1 %v923_v45 }
 0x153   : > { %v926_v50 = vmax.f32 %v804_v47, 0.0  ;;  %2684 = vmatmul.mubr.f32.gmra.mrb[40].mxu1 %v924_v44 }
 0x154   : > { %v925_v51 = vmax.f32 %v799_v49, 0.0  ;;  %v2563_v52 = vpop.f32.mrb[50].mxu0 }
 0x155   : > { %v814_v53 = vadd.f32 %v2563_v52, %v3395_v27  ;;  %v808_v54 = vpop.f32.mrb[51].mxu0 }
 0x156   : > { %v809_v55 = vadd.f32 %v3395_v27, %v808_v54  ;;  %2686 = vmatprep.mubr.f32.mxu1 %v925_v51 }
 0x157   : > { %v928_v56 = vmax.f32 %v814_v53, 0.0  ;;  %2687 = vmatmul.mubr.f32.gmra.mrb[42].mxu1 %v926_v50 }
 0x158   : > { %v927_v57 = vmax.f32 %v809_v55, 0.0  ;;  %v2566_v58 = vpop.f32.mrb[52].mxu0 }
 0x159   : > { %v824_v59 = vadd.f32 %v2566_v58, %v3395_v27  ;;  %v818_v60 = vpop.f32.mrb[53].mxu0 }
 0x15a   : > { %v819_v61 = vadd.f32 %v3395_v27, %v818_v60  ;;  %2689 = vmatprep.mubr.f32.mxu1 %v927_v57 }
 0x15b   : > { %v930_v62 = vmax.f32 %v824_v59, 0.0  ;;  %2690 = vmatmul.mubr.f32.gmra.mrb[44].mxu1 %v928_v56 }
 0x15c   : > { %v929_v63 = vmax.f32 %v819_v61, 0.0  ;;  %v2569_v0 = vpop.f32.mrb[54].mxu0 }
 0x15d   : > { %v834_v1 = vadd.f32 %v2569_v0, %v3395_v27  ;;  %v828_v2 = vpop.f32.mrb[55].mxu0 }
 0x15e   : > { %v829_v3 = vadd.f32 %v3395_v27, %v828_v2  ;;  %2692 = vmatprep.mubr.f32.mxu1 %v929_v63 }
 0x15f   : > { %v932_v4 = vmax.f32 %v834_v1, 0.0  ;;  %2693 = vmatmul.mubr.f32.gmra.mrb[46].mxu1 %v930_v62 }
 0x160   : > { %v931_v5 = vmax.f32 %v829_v3, 0.0  ;;  %v2572_v6 = vpop.f32.mrb[56].mxu0 }
 0x161   : > { %v844_v7 = vadd.f32 %v2572_v6, %v3395_v27  ;;  %v838_v8 = vpop.f32.mrb[57].mxu0 }
 0x162   : > { %v839_v9 = vadd.f32 %v3395_v27, %v838_v8  ;;  %2695 = vmatprep.mubr.f32.mxu1 %v931_v5 }
 0x163   : > { %v934_v10 = vmax.f32 %v844_v7, 0.0  ;;  %2696 = vmatmul.mubr.f32.gmra.mrb[48].mxu1 %v932_v4 }
 0x164   : > { %v933_v11 = vmax.f32 %v839_v9, 0.0  ;;  %v2575_v12 = vpop.f32.mrb[58].mxu0 }
 0x165   : > { %v854_v13 = vadd.f32 %v2575_v12, %v3395_v27  ;;  %v848_v14 = vpop.f32.mrb[59].mxu0 }
 0x166   : > { %v849_v15 = vadd.f32 %v3395_v27, %v848_v14  ;;  %2698 = vmatprep.mubr.f32.mxu1 %v933_v11 }
 0x167   : > { %v936_v16 = vmax.f32 %v854_v13, 0.0  ;;  %2699 = vmatmul.mubr.f32.gmra.mrb[50].mxu1 %v934_v10 }
 0x168   : > { %v935_v17 = vmax.f32 %v849_v15, 0.0  ;;  %v2578_v18 = vpop.f32.mrb[60].mxu0 }
 0x169   : > { %v864_v19 = vadd.f32 %v2578_v18, %v3395_v27  ;;  %v858_v20 = vpop.f32.mrb[61].mxu0 }
 0x16a   : > { %v859_v21 = vadd.f32 %v3395_v27, %v858_v20  ;;  %2701 = vmatprep.mubr.f32.mxu1 %v935_v17 }
 0x16b   : > { %v938_v22 = vmax.f32 %v864_v19, 0.0  ;;  %2702 = vmatmul.mubr.f32.gmra.mrb[52].mxu1 %v936_v16 }
 0x16c   : > { %v937_v23 = vmax.f32 %v859_v21, 0.0  ;;  %v2581_v24 = vpop.f32.mrb[62].mxu0 }
 0x16d   : > { %v874_v25 = vadd.f32 %v2581_v24, %v3395_v27  ;;  %v868_v26 = vpop.f32.mrb[63].mxu0 }
 0x16e   : > { %v869_v28 = vadd.f32 %v3395_v27, %v868_v26  ;;  %2704 = vmatprep.mubr.f32.mxu1 %v937_v23 }
 0x16f   : > { %v940_v29 = vmax.f32 %v874_v25, 0.0  ;;  %2705 = vmatmul.mubr.f32.gmra.mrb[54].mxu1 %v938_v22 }
 0x170   : > { %v939_v30 = vmax.f32 %v869_v28, 0.0 }
 0x172   : > { %2707 = vmatprep.mubr.f32.mxu1 %v939_v30 }
 0x173   : > { %2708 = vmatmul.mubr.f32.gmra.mrb[56].mxu1 %v940_v29 }
 0x1ca   : > { %v2616_v32 = vpop.f32.mrb[64].mxu0 }
 0x1cb   : > { %v3467_v33 = vadd.f32 %v2616_v32, %v3464_v31  ;;  %v1030_v34 = vpop.f32.mrb[65].mxu0 }
 0x1cc   : > { %v3471_v27 = vadd.f32 %v3464_v31, %v1030_v34 }
 0x1cd   : > { %1351 = vmax.xlane.f32.xlu0 %v3467_v33 }
 0x1ce   : > { %v2619_v35 = vpop.f32.mrb[66].mxu0 }
 0x1cf   : > { %v3474_v36 = vadd.f32 %v2619_v35, %v3464_v31  ;;  %v1040_v37 = vpop.f32.mrb[67].mxu0 }
 0x1d0   : > { %v3479_v39 = vadd.f32 %v3464_v31, %v1040_v37 }
 0x1d1   : > { %1355 = vmax.xlane.f32.xlu1 %v3474_v36  ;;  %1349 = vmax.xlane.f32.xlu0 %v3471_v27 }
 0x1d2   : > { %v2622_v38 = vpop.f32.mrb[68].mxu0 }
 0x1d3   : > { %v1050_v40 = vpop.f32.mrb[69].mxu0  ;;  %v3487_v43 = vadd.f32 %v2622_v38, %v3464_v31 }
 0x1d4   : > { %v3482_v41 = vadd.f32 %v3464_v31, %v1050_v40 }
 0x1d5   : > { %1353 = vmax.xlane.f32.xlu1 %v3479_v39 }
 0x1d6   : > { %v2625_v42 = vpop.f32.mrb[0].mxu1  ;;  %1357 = vmax.xlane.f32.xlu0 %v3482_v41 }
 0x1d7   : > { %v1060_v44 = vpop.f32.mrb[1].mxu1  ;;  %v3495_v47 = vadd.f32 %v2625_v42, %v3464_v31 }
 0x1d8   : > { %v3490_v45 = vadd.f32 %v3464_v31, %v1060_v44 }
 0x1d9   : > { %1359 = vmax.xlane.f32.xlu1 %v3487_v43 }
 0x1da   : > { %v2628_v46 = vpop.f32.mrb[2].mxu1  ;;  %1361 = vmax.xlane.f32.xlu0 %v3490_v45 }
 0x1db   : > { %v1070_v48 = vpop.f32.mrb[3].mxu1  ;;  %v3503_v51 = vadd.f32 %v2628_v46, %v3464_v31 }
 0x1dc   : > { %v3498_v49 = vadd.f32 %v3464_v31, %v1070_v48 }
 0x1dd   : > { %1363 = vmax.xlane.f32.xlu1 %v3495_v47 }
 0x1de   : > { %v2631_v50 = vpop.f32.mrb[4].mxu1  ;;  %1365 = vmax.xlane.f32.xlu0 %v3498_v49 }
 0x1df   : > { %v1080_v52 = vpop.f32.mrb[5].mxu1  ;;  %v3511_v55 = vadd.f32 %v2631_v50, %v3464_v31 }
 0x1e0   : > { %v3506_v53 = vadd.f32 %v3464_v31, %v1080_v52 }
 0x1e1   : > { %1367 = vmax.xlane.f32.xlu1 %v3503_v51 }
 0x1e2   : > { %v2634_v54 = vpop.f32.mrb[6].mxu1  ;;  %1369 = vmax.xlane.f32.xlu0 %v3506_v53 }
 0x1e3   : > { %v1090_v56 = vpop.f32.mrb[7].mxu1  ;;  %v3519_v59 = vadd.f32 %v2634_v54, %v3464_v31 }
 0x1e4   : > { %v3514_v57 = vadd.f32 %v3464_v31, %v1090_v56 }
 0x1e5   : > { %1371 = vmax.xlane.f32.xlu1 %v3511_v55 }
 0x1e6   : > { %v2637_v58 = vpop.f32.mrb[8].mxu1  ;;  %1373 = vmax.xlane.f32.xlu0 %v3514_v57 }
 0x1e7   : > { %v1100_v60 = vpop.f32.mrb[9].mxu1  ;;  %v3527_v63 = vadd.f32 %v2637_v58, %v3464_v31 }
 0x1e8   : > { %v3522_v61 = vadd.f32 %v3464_v31, %v1100_v60 }
 0x1e9   : > { %1375 = vmax.xlane.f32.xlu1 %v3519_v59 }
 0x1ea   : > { %v2640_v62 = vpop.f32.mrb[10].mxu1  ;;  %1377 = vmax.xlane.f32.xlu0 %v3522_v61 }
 0x1eb   : > { %v1110_v0 = vpop.f32.mrb[11].mxu1  ;;  %v3535_v3 = vadd.f32 %v2640_v62, %v3464_v31 }
 0x1ec   : > { %v3530_v1 = vadd.f32 %v3464_v31, %v1110_v0 }
 0x1ed   : > { %1379 = vmax.xlane.f32.xlu1 %v3527_v63 }
 0x1ee   : > { %v2643_v2 = vpop.f32.mrb[12].mxu1  ;;  %1381 = vmax.xlane.f32.xlu0 %v3530_v1 }
 0x1ef   : > { %v1120_v4 = vpop.f32.mrb[13].mxu1  ;;  %v3543_v7 = vadd.f32 %v2643_v2, %v3464_v31 }
 0x1f0   : > { %v3538_v5 = vadd.f32 %v3464_v31, %v1120_v4 }
 0x1f1   : > { %1383 = vmax.xlane.f32.xlu1 %v3535_v3 }
 0x1f2   : > { %v2646_v6 = vpop.f32.mrb[14].mxu1  ;;  %1385 = vmax.xlane.f32.xlu0 %v3538_v5 }
 0x1f3   : > { %v1130_v8 = vpop.f32.mrb[15].mxu1  ;;  %v3551_v11 = vadd.f32 %v2646_v6, %v3464_v31 }
 0x1f4   : > { %v3546_v9 = vadd.f32 %v3464_v31, %v1130_v8 }
 0x1f5   : > { %1387 = vmax.xlane.f32.xlu1 %v3543_v7 }
 0x1f6   : > { %v2649_v10 = vpop.f32.mrb[16].mxu1  ;;  %1389 = vmax.xlane.f32.xlu0 %v3546_v9 }
 0x1f7   : > { %v1140_v12 = vpop.f32.mrb[17].mxu1  ;;  %v3559_v15 = vadd.f32 %v2649_v10, %v3464_v31 }
 0x1f8   : > { %v3554_v13 = vadd.f32 %v3464_v31, %v1140_v12 }
 0x1f9   : > { %1391 = vmax.xlane.f32.xlu1 %v3551_v11 }
 0x1fa   : > { %v2652_v14 = vpop.f32.mrb[18].mxu1  ;;  %1393 = vmax.xlane.f32.xlu0 %v3554_v13 }
 0x1fb   : > { %v1150_v16 = vpop.f32.mrb[19].mxu1  ;;  %v3567_v19 = vadd.f32 %v2652_v14, %v3464_v31 }
 0x1fc   : > { %v3562_v17 = vadd.f32 %v3464_v31, %v1150_v16 }
 0x1fd   : > { %1395 = vmax.xlane.f32.xlu1 %v3559_v15 }
 0x1fe   : > { %v2655_v18 = vpop.f32.mrb[20].mxu1  ;;  %1397 = vmax.xlane.f32.xlu0 %v3562_v17 }
 0x1ff   : > { %v1160_v20 = vpop.f32.mrb[21].mxu1  ;;  %v3575_v23 = vadd.f32 %v2655_v18, %v3464_v31 }
 0x200   : > { %v3570_v21 = vadd.f32 %v3464_v31, %v1160_v20 }
 0x201   : > { %1399 = vmax.xlane.f32.xlu1 %v3567_v19 }
 0x202   : > { %v2658_v22 = vpop.f32.mrb[22].mxu1  ;;  %1401 = vmax.xlane.f32.xlu0 %v3570_v21 }
 0x203   : > { %v1170_v24 = vpop.f32.mrb[23].mxu1  ;;  %v3583_v28 = vadd.f32 %v2658_v22, %v3464_v31 }
 0x204   : > { %v3578_v25 = vadd.f32 %v3464_v31, %v1170_v24 }
 0x205   : > { %1403 = vmax.xlane.f32.xlu1 %v3575_v23 }
 0x206   : > { %v2661_v26 = vpop.f32.mrb[24].mxu1  ;;  %1405 = vmax.xlane.f32.xlu0 %v3578_v25 }
 0x207   : > { %v1180_v29 = vpop.f32.mrb[25].mxu1  ;;  %v3591_v34 = vadd.f32 %v2661_v26, %v3464_v31 }
 0x208   : > { %v3586_v30 = vadd.f32 %v3464_v31, %v1180_v29 }
 0x209   : > { %1407 = vmax.xlane.f32.xlu1 %v3583_v28 }
 0x20a   : > { %v2664_v32 = vpop.f32.mrb[26].mxu1  ;;  %1409 = vmax.xlane.f32.xlu0 %v3586_v30 }
 0x20b   : > { %v1190_v35 = vpop.f32.mrb[27].mxu1  ;;  %v3599_v40 = vadd.f32 %v2664_v32, %v3464_v31 }
 0x20c   : > { %v3594_v37 = vadd.f32 %v3464_v31, %v1190_v35 }
 0x20d   : > { %1411 = vmax.xlane.f32.xlu1 %v3591_v34 }
 0x20e   : > { %v2667_v38 = vpop.f32.mrb[28].mxu1  ;;  %1413 = vmax.xlane.f32.xlu0 %v3594_v37 }
 0x20f   : > { %v1200_v42 = vpop.f32.mrb[29].mxu1  ;;  %v3607_v48 = vadd.f32 %v2667_v38, %v3464_v31 }
 0x210   : > { %v3602_v44 = vadd.f32 %v3464_v31, %v1200_v42 }
 0x211   : > { %1415 = vmax.xlane.f32.xlu1 %v3599_v40 }
 0x212   : > { %v2670_v46 = vpop.f32.mrb[30].mxu1  ;;  %1417 = vmax.xlane.f32.xlu0 %v3602_v44 }
 0x213   : > { %v1210_v50 = vpop.f32.mrb[31].mxu1  ;;  %v3615_v56 = vadd.f32 %v2670_v46, %v3464_v31 }
 0x214   : > { %v3610_v52 = vadd.f32 %v3464_v31, %v1210_v50 }
 0x215   : > { %1419 = vmax.xlane.f32.xlu1 %v3607_v48 }
 0x216   : > { %v2673_v54 = vpop.f32.mrb[32].mxu1  ;;  %1421 = vmax.xlane.f32.xlu0 %v3610_v52 }
 0x217   : > { %v1220_v58 = vpop.f32.mrb[33].mxu1  ;;  %v3623_v0 = vadd.f32 %v2673_v54, %v3464_v31 }
 0x218   : > { %v3618_v60 = vadd.f32 %v3464_v31, %v1220_v58 }
 0x219   : > { %1423 = vmax.xlane.f32.xlu1 %v3615_v56 }
 0x21a   : > { %v2676_v62 = vpop.f32.mrb[34].mxu1  ;;  %1425 = vmax.xlane.f32.xlu0 %v3618_v60 }
 0x21b   : > { %v1230_v2 = vpop.f32.mrb[35].mxu1  ;;  %v3631_v8 = vadd.f32 %v2676_v62, %v3464_v31 }
 0x21c   : > { %v3626_v4 = vadd.f32 %v3464_v31, %v1230_v2 }
 0x21d   : > { %1427 = vmax.xlane.f32.xlu1 %v3623_v0 }
 0x21e   : > { %v2679_v6 = vpop.f32.mrb[36].mxu1  ;;  %1429 = vmax.xlane.f32.xlu0 %v3626_v4 }
 0x21f   : > { %v1240_v10 = vpop.f32.mrb[37].mxu1  ;;  %v3639_v16 = vadd.f32 %v2679_v6, %v3464_v31 }
 0x220   : > { %v3634_v12 = vadd.f32 %v3464_v31, %v1240_v10 }
 0x221   : > { %1431 = vmax.xlane.f32.xlu1 %v3631_v8 }
 0x222   : > { %v2682_v14 = vpop.f32.mrb[38].mxu1  ;;  %1433 = vmax.xlane.f32.xlu0 %v3634_v12 }
 0x223   : > { %v1250_v18 = vpop.f32.mrb[39].mxu1  ;;  %v3647_v24 = vadd.f32 %v2682_v14, %v3464_v31 }
 0x224   : > { %v3642_v20 = vadd.f32 %v3464_v31, %v1250_v18 }
 0x225   : > { %1435 = vmax.xlane.f32.xlu1 %v3639_v16 }
 0x226   : > { %v2685_v22 = vpop.f32.mrb[40].mxu1  ;;  %1437 = vmax.xlane.f32.xlu0 %v3642_v20 }
 0x227   : > { %v1260_v26 = vpop.f32.mrb[41].mxu1  ;;  %v3655_v35 = vadd.f32 %v2685_v22, %v3464_v31 }
 0x228   : > { %v3650_v29 = vadd.f32 %v3464_v31, %v1260_v26 }
 0x229   : > { %1439 = vmax.xlane.f32.xlu1 %v3647_v24 }
 0x22a   : > { %v2688_v32 = vpop.f32.mrb[42].mxu1  ;;  %1441 = vmax.xlane.f32.xlu0 %v3650_v29 }
 0x22b   : > { %v1270_v38 = vpop.f32.mrb[43].mxu1  ;;  %v3663_v50 = vadd.f32 %v2688_v32, %v3464_v31 }
 0x22c   : > { %v3658_v42 = vadd.f32 %v3464_v31, %v1270_v38 }
 0x22d   : > { %1443 = vmax.xlane.f32.xlu1 %v3655_v35 }
 0x22e   : > { %v2691_v46 = vpop.f32.mrb[44].mxu1  ;;  %1445 = vmax.xlane.f32.xlu0 %v3658_v42 }
 0x22f   : > { %v1280_v54 = vpop.f32.mrb[45].mxu1  ;;  %v3671_v2 = vadd.f32 %v2691_v46, %v3464_v31 }
 0x230   : > { %v3666_v58 = vadd.f32 %v3464_v31, %v1280_v54 }
 0x231   : > { %1447 = vmax.xlane.f32.xlu1 %v3663_v50  ;;  %4208 = vst [vmem:[#allocation6_spill] sm:$0xff] %v3671_v2 }
 0x232   : > { %4207 = vst [vmem:[#allocation5_spill] sm:$0xff] %v3666_v58  ;;  %v2694_v62 = vpop.f32.mrb[46].mxu1  ;;  %1449 = vmax.xlane.f32.xlu0 %v3666_v58 }
 0x233   : > { %v1290_v6 = vpop.f32.mrb[47].mxu1  ;;  %v3679_v18 = vadd.f32 %v2694_v62, %v3464_v31 }
 0x234   : > { %v3674_v10 = vadd.f32 %v3464_v31, %v1290_v6 }
 0x235   : > { %1451 = vmax.xlane.f32.xlu1 %v3671_v2  ;;  %4210 = vst [vmem:[#allocation8_spill] sm:$0xff] %v3679_v18 }
 0x236   : > { %4209 = vst [vmem:[#allocation7_spill] sm:$0xff] %v3674_v10  ;;  %v2697_v14 = vpop.f32.mrb[48].mxu1  ;;  %1453 = vmax.xlane.f32.xlu0 %v3674_v10 }
 0x237   : > { %v1300_v22 = vpop.f32.mrb[49].mxu1  ;;  %v3687_v38 = vadd.f32 %v2697_v14, %v3464_v31 }
 0x238   : > { %v3682_v26 = vadd.f32 %v3464_v31, %v1300_v22 }
 0x239   : > { %1455 = vmax.xlane.f32.xlu1 %v3679_v18  ;;  %4212 = vst [vmem:[#allocation10_spill] sm:$0xff] %v3687_v38 }
 0x23a   : > { %4211 = vst [vmem:[#allocation9_spill] sm:$0xff] %v3682_v26  ;;  %v2700_v32 = vpop.f32.mrb[50].mxu1  ;;  %1457 = vmax.xlane.f32.xlu0 %v3682_v26 }
 0x23b   : > { %v1310_v46 = vpop.f32.mrb[51].mxu1  ;;  %v3695_v6 = vadd.f32 %v2700_v32, %v3464_v31 }
 0x23c   : > { %v3690_v54 = vadd.f32 %v3464_v31, %v1310_v46 }
 0x23d   : > { %1459 = vmax.xlane.f32.xlu1 %v3687_v38  ;;  %4214 = vst [vmem:[#allocation12_spill] sm:$0xff] %v3695_v6 }
 0x23e   : > { %4213 = vst [vmem:[#allocation11_spill] sm:$0xff] %v3690_v54  ;;  %v2703_v62 = vpop.f32.mrb[52].mxu1  ;;  %1461 = vmax.xlane.f32.xlu0 %v3690_v54 }
 0x23f   : > { %v1320_v22 = vpop.f32.mrb[53].mxu1  ;;  %v3703_v46 = vadd.f32 %v2703_v62, %v3464_v31 }
 0x240   : > { %v3698_v18 = vadd.f32 %v3464_v31, %v1320_v22 }
 0x241   : > { %1463 = vmax.xlane.f32.xlu1 %v3695_v6  ;;  %4216 = vst [vmem:[#allocation14_spill] sm:$0xff] %v3703_v46 }
 0x242   : > { %4215 = vst [vmem:[#allocation13_spill] sm:$0xff] %v3698_v18  ;;  %v2706_v14 = vpop.f32.mrb[54].mxu1  ;;  %1465 = vmax.xlane.f32.xlu0 %v3698_v18 }
 0x243   : > { %v1330_v26 = vpop.f32.mrb[55].mxu1  ;;  %v3711_v22 = vadd.f32 %v2706_v14, %v3464_v31 }
 0x244   : > { %v3706_v38 = vadd.f32 %v3464_v31, %v1330_v26 }
 0x245   : > { %1467 = vmax.xlane.f32.xlu1 %v3703_v46  ;;  %4218 = vst [vmem:[#allocation16_spill] sm:$0xff] %v3711_v22 }
 0x246   : > { %4217 = vst [vmem:[#allocation15_spill] sm:$0xff] %v3706_v38  ;;  %v2709_v32 = vpop.f32.mrb[56].mxu1  ;;  %1469 = vmax.xlane.f32.xlu0 %v3706_v38 }
 0x247   : > { %v1340_v54 = vpop.f32.mrb[57].mxu1  ;;  %v3719_v62 = vadd.f32 %v2709_v32, %v3464_v31 }
 0x248   : > { %v3714_v6 = vadd.f32 %v3464_v31, %v1340_v54 }
 0x249   : > { %1471 = vmax.xlane.f32.xlu1 %v3711_v22  ;;  %4220 = vst [vmem:[#allocation18_spill] sm:$0xff] %v3719_v62 }
 0x24a   : > { %4219 = vst [vmem:[#allocation17_spill] sm:$0xff] %v3714_v6  ;;  %1473 = vmax.xlane.f32.xlu0 %v3714_v6 }
 0x24d   : > { %1475 = vmax.xlane.f32.xlu1 %v3719_v62 }
 0x25a   : > { %v1352_v26 = vpop.xlane.xlu0 %1351 }
 0x25b   : > { %v1478_v46 = vsub.f32 %v3467_v33, %v1352_v26 }
 0x25d   : > { %v1543_v38 = vmul.f32 1.442695, %v1478_v46 }
 0x25e   : > { %v1356_v18 = vpop.xlane.xlu1 %1355  ;;  %v1350_v14 = vpop.xlane.xlu0 %1349 }
 0x25f   : > { %2803 = vpow2.f32 %v1543_v38  ;;  %v1480_v10 = vsub.f32 %v3474_v36, %v1356_v18  ;;  %v1477_v54 = vsub.f32 %v3471_v27, %v1350_v14 }
 0x261   : > { %v1547_v2 = vmul.f32 1.442695, %v1480_v10  ;;  %v1541_v22 = vmul.f32 1.442695, %v1477_v54 }
 0x262   : > { %v1354_v58 = vpop.xlane.xlu1 %1353 }
 0x263   : > { %2805 = vpow2.f32 %v1547_v2  ;;  %v1479_v31 = vsub.f32 %v3479_v39, %v1354_v58  ;;  %v1358_v32 = vpop.xlane.xlu0 %1357 }
 0x264   : > { %2807 = vpow2.f32 %v1541_v22  ;;  %v1481_v62 = vsub.f32 %v3482_v41, %v1358_v32 }
 0x265   : > { %v1545_v6 = vmul.f32 1.442695, %v1479_v31 }
 0x266   : > { %v1360_v33 = vpop.xlane.xlu1 %1359  ;;  %v1549_v26 = vmul.f32 1.442695, %v1481_v62 }
 0x267   : > { %2809 = vpow2.f32 %v1545_v6  ;;  %v1482_v46 = vsub.f32 %v3487_v43, %v1360_v33  ;;  %v1362_v38 = vpop.xlane.xlu0 %1361 }
 0x268   : > { %v1483_v36 = vsub.f32 %v3490_v45, %v1362_v38 }
 0x269   : > { %v3729_v27 = vpop.eup %2803  ;;  %v1551_v10 = vmul.f32 1.442695, %v1482_v46 }
 0x26a   : > { %1671 = vadd.xlane.f32.xlu1 %v3729_v27  ;;  %v1364_v2 = vpop.xlane.xlu1 %1363  ;;  %v1553_v41 = vmul.f32 1.442695, %v1483_v36 }
 0x26b   : > { %2811 = vpow2.f32 %v1551_v10  ;;  %v1484_v39 = vsub.f32 %v3495_v47, %v1364_v2  ;;  %v1366_v58 = vpop.xlane.xlu0 %1365 }
 0x26c   : > { %2813 = vpow2.f32 %v1549_v26  ;;  %v1485_v18 = vsub.f32 %v3498_v49, %v1366_v58 }
 0x26d   : > { %v3734_v6 = vpop.eup %2805  ;;  %v1555_v43 = vmul.f32 1.442695, %v1484_v39 }
 0x26e   : > { %v3736_v22 = vpop.eup %2807  ;;  %1675 = vadd.xlane.f32.xlu1 %v3734_v6  ;;  %v1368_v45 = vpop.xlane.xlu1 %1367  ;;  %v1557_v47 = vmul.f32 1.442695, %v1485_v18 }
 0x26f   : > { %2815 = vpow2.f32 %v1555_v43  ;;  %v1486_v62 = vsub.f32 %v3503_v51, %v1368_v45  ;;  %1669 = vadd.xlane.f32.xlu0 %v3736_v22  ;;  %v1370_v14 = vpop.xlane.xlu0 %1369 }
 0x270   : > { %2817 = vpow2.f32 %v1553_v41  ;;  %v1487_v54 = vsub.f32 %v3506_v53, %v1370_v14 }
 0x271   : > { %v3742_v31 = vpop.eup %2809  ;;  %v1559_v49 = vmul.f32 1.442695, %v1486_v62 }
 0x272   : > { %v1372_v32 = vpop.xlane.xlu1 %1371  ;;  %v1561_v38 = vmul.f32 1.442695, %v1487_v54 }
 0x273   : > { %2819 = vpow2.f32 %v1559_v49  ;;  %v1488_v33 = vsub.f32 %v3511_v55, %v1372_v32  ;;  %1673 = vadd.xlane.f32.xlu0 %v3742_v31  ;;  %v1374_v46 = vpop.xlane.xlu0 %1373 }
 0x274   : > { %2821 = vpow2.f32 %v1557_v47  ;;  %v1489_v51 = vsub.f32 %v3514_v57, %v1374_v46 }
 0x275   : > { %v3747_v26 = vpop.eup %2811  ;;  %v1563_v36 = vmul.f32 1.442695, %v1488_v33 }
 0x276   : > { %v3749_v10 = vpop.eup %2813  ;;  %1679 = vadd.xlane.f32.xlu1 %v3747_v26  ;;  %v1376_v53 = vpop.xlane.xlu1 %1375  ;;  %v1565_v39 = vmul.f32 1.442695, %v1489_v51 }
 0x277   : > { %2823 = vpow2.f32 %v1563_v36  ;;  %v1490_v2 = vsub.f32 %v3519_v59, %v1376_v53  ;;  %1677 = vadd.xlane.f32.xlu0 %v3749_v10  ;;  %v1378_v55 = vpop.xlane.xlu0 %1377 }
 0x278   : > { %2825 = vpow2.f32 %v1561_v38  ;;  %v1491_v58 = vsub.f32 %v3522_v61, %v1378_v55 }
 0x279   : > { %v3755_v41 = vpop.eup %2815  ;;  %v1567_v57 = vmul.f32 1.442695, %v1490_v2 }
 0x27a   : > { %v3757_v18 = vpop.eup %2817  ;;  %1683 = vadd.xlane.f32.xlu1 %v3755_v41  ;;  %v1380_v43 = vpop.xlane.xlu1 %1379  ;;  %v1569_v62 = vmul.f32 1.442695, %v1491_v58 }
 0x27b   : > { %2827 = vpow2.f32 %v1567_v57  ;;  %v1492_v45 = vsub.f32 %v3527_v63, %v1380_v43  ;;  %1681 = vadd.xlane.f32.xlu0 %v3757_v18  ;;  %v1382_v59 = vpop.xlane.xlu0 %1381 }
 0x27c   : > { %2829 = vpow2.f32 %v1565_v39  ;;  %v1493_v14 = vsub.f32 %v3530_v1, %v1382_v59 }
 0x27d   : > { %v3763_v47 = vpop.eup %2819  ;;  %v1571_v61 = vmul.f32 1.442695, %v1492_v45 }
 0x27e   : > { %v3765_v54 = vpop.eup %2821  ;;  %1687 = vadd.xlane.f32.xlu1 %v3763_v47  ;;  %v1384_v49 = vpop.xlane.xlu1 %1383  ;;  %v1573_v33 = vmul.f32 1.442695, %v1493_v14 }
 0x27f   : > { %2831 = vpow2.f32 %v1571_v61  ;;  %v1494_v32 = vsub.f32 %v3535_v3, %v1384_v49  ;;  %1685 = vadd.xlane.f32.xlu0 %v3765_v54  ;;  %v1386_v63 = vpop.xlane.xlu0 %1385 }
 0x280   : > { %2833 = vpow2.f32 %v1569_v62  ;;  %v1495_v46 = vsub.f32 %v3538_v5, %v1386_v63 }
 0x281   : > { %v3771_v38 = vpop.eup %2823  ;;  %v1575_v1 = vmul.f32 1.442695, %v1494_v32 }
 0x282   : > { %v3773_v51 = vpop.eup %2825  ;;  %1691 = vadd.xlane.f32.xlu1 %v3771_v38  ;;  %v1388_v36 = vpop.xlane.xlu1 %1387  ;;  %v1577_v2 = vmul.f32 1.442695, %v1495_v46 }
 0x283   : > { %2835 = vpow2.f32 %v1575_v1  ;;  %v1496_v53 = vsub.f32 %v3543_v7, %v1388_v36  ;;  %1689 = vadd.xlane.f32.xlu0 %v3773_v51  ;;  %v1390_v3 = vpop.xlane.xlu0 %1389 }
 0x284   : > { %2837 = vpow2.f32 %v1573_v33  ;;  %v1497_v55 = vsub.f32 %v3546_v9, %v1390_v3 }
 0x285   : > { %v3779_v39 = vpop.eup %2827  ;;  %v1579_v5 = vmul.f32 1.442695, %v1496_v53 }
 0x286   : > { %v3781_v58 = vpop.eup %2829  ;;  %1695 = vadd.xlane.f32.xlu1 %v3779_v39  ;;  %v1392_v57 = vpop.xlane.xlu1 %1391  ;;  %v1581_v45 = vmul.f32 1.442695, %v1497_v55 }
 0x287   : > { %2839 = vpow2.f32 %v1579_v5  ;;  %v1498_v43 = vsub.f32 %v3551_v11, %v1392_v57  ;;  %1693 = vadd.xlane.f32.xlu0 %v3781_v58  ;;  %v1394_v7 = vpop.xlane.xlu0 %1393 }
 0x288   : > { %2841 = vpow2.f32 %v1577_v2  ;;  %v1499_v59 = vsub.f32 %v3554_v13, %v1394_v7 }
 0x289   : > { %v3787_v62 = vpop.eup %2831  ;;  %v1583_v9 = vmul.f32 1.442695, %v1498_v43 }
 0x28a   : > { %v3789_v14 = vpop.eup %2833  ;;  %1699 = vadd.xlane.f32.xlu1 %v3787_v62  ;;  %v1396_v61 = vpop.xlane.xlu1 %1395  ;;  %v1585_v32 = vmul.f32 1.442695, %v1499_v59 }
 0x28b   : > { %2843 = vpow2.f32 %v1583_v9  ;;  %v1500_v49 = vsub.f32 %v3559_v15, %v1396_v61  ;;  %1697 = vadd.xlane.f32.xlu0 %v3789_v14  ;;  %v1398_v11 = vpop.xlane.xlu0 %1397 }
 0x28c   : > { %2845 = vpow2.f32 %v1581_v45  ;;  %v1501_v63 = vsub.f32 %v3562_v17, %v1398_v11 }
 0x28d   : > { %v3795_v33 = vpop.eup %2835  ;;  %v1587_v13 = vmul.f32 1.442695, %v1500_v49 }
 0x28e   : > { %v3797_v46 = vpop.eup %2837  ;;  %1703 = vadd.xlane.f32.xlu1 %v3795_v33  ;;  %v1400_v1 = vpop.xlane.xlu1 %1399  ;;  %v1589_v53 = vmul.f32 1.442695, %v1501_v63 }
 0x28f   : > { %2847 = vpow2.f32 %v1587_v13  ;;  %v1502_v36 = vsub.f32 %v3567_v19, %v1400_v1  ;;  %1701 = vadd.xlane.f32.xlu0 %v3797_v46  ;;  %v1402_v15 = vpop.xlane.xlu0 %1401 }
 0x290   : > { %2849 = vpow2.f32 %v1585_v32  ;;  %v1503_v3 = vsub.f32 %v3570_v21, %v1402_v15 }
 0x291   : > { %v3803_v2 = vpop.eup %2839  ;;  %v1591_v17 = vmul.f32 1.442695, %v1502_v36 }
 0x292   : > { %v3805_v55 = vpop.eup %2841  ;;  %1707 = vadd.xlane.f32.xlu1 %v3803_v2  ;;  %v1404_v5 = vpop.xlane.xlu1 %1403  ;;  %v1593_v43 = vmul.f32 1.442695, %v1503_v3 }
 0x293   : > { %2851 = vpow2.f32 %v1591_v17  ;;  %v1504_v57 = vsub.f32 %v3575_v23, %v1404_v5  ;;  %1705 = vadd.xlane.f32.xlu0 %v3805_v55  ;;  %v1406_v19 = vpop.xlane.xlu0 %1405 }
 0x294   : > { %2853 = vpow2.f32 %v1589_v53  ;;  %v1505_v7 = vsub.f32 %v3578_v25, %v1406_v19 }
 0x295   : > { %v3811_v45 = vpop.eup %2843  ;;  %v1595_v21 = vmul.f32 1.442695, %v1504_v57 }
 0x296   : > { %v3813_v59 = vpop.eup %2845  ;;  %1711 = vadd.xlane.f32.xlu1 %v3811_v45  ;;  %v1408_v9 = vpop.xlane.xlu1 %1407  ;;  %v1597_v49 = vmul.f32 1.442695, %v1505_v7 }
 0x297   : > { %2855 = vpow2.f32 %v1595_v21  ;;  %v1506_v61 = vsub.f32 %v3583_v28, %v1408_v9  ;;  %1709 = vadd.xlane.f32.xlu0 %v3813_v59  ;;  %v1410_v23 = vpop.xlane.xlu0 %1409 }
 0x298   : > { %2857 = vpow2.f32 %v1593_v43  ;;  %v1507_v11 = vsub.f32 %v3586_v30, %v1410_v23 }
 0x299   : > { %v3819_v32 = vpop.eup %2847  ;;  %v1599_v25 = vmul.f32 1.442695, %v1506_v61 }
 0x29a   : > { %v3821_v63 = vpop.eup %2849  ;;  %1715 = vadd.xlane.f32.xlu1 %v3819_v32  ;;  %v1412_v13 = vpop.xlane.xlu1 %1411  ;;  %v1601_v36 = vmul.f32 1.442695, %v1507_v11 }
 0x29b   : > { %2859 = vpow2.f32 %v1599_v25  ;;  %v1508_v1 = vsub.f32 %v3591_v34, %v1412_v13  ;;  %1713 = vadd.xlane.f32.xlu0 %v3821_v63  ;;  %v1414_v28 = vpop.xlane.xlu0 %1413 }
 0x29c   : > { %2861 = vpow2.f32 %v1597_v49  ;;  %v1509_v15 = vsub.f32 %v3594_v37, %v1414_v28 }
 0x29d   : > { %v3827_v53 = vpop.eup %2851  ;;  %v1603_v30 = vmul.f32 1.442695, %v1508_v1 }
 0x29e   : > { %v3829_v3 = vpop.eup %2853  ;;  %1719 = vadd.xlane.f32.xlu1 %v3827_v53  ;;  %v1416_v17 = vpop.xlane.xlu1 %1415  ;;  %v1605_v57 = vmul.f32 1.442695, %v1509_v15 }
 0x29f   : > { %2863 = vpow2.f32 %v1603_v30  ;;  %v1510_v5 = vsub.f32 %v3599_v40, %v1416_v17  ;;  %1717 = vadd.xlane.f32.xlu0 %v3829_v3  ;;  %v1418_v34 = vpop.xlane.xlu0 %1417 }
 0x2a0   : > { %2865 = vpow2.f32 %v1601_v36  ;;  %v1511_v19 = vsub.f32 %v3602_v44, %v1418_v34 }
 0x2a1   : > { %v3835_v43 = vpop.eup %2855  ;;  %v1607_v37 = vmul.f32 1.442695, %v1510_v5 }
 0x2a2   : > { %v3837_v7 = vpop.eup %2857  ;;  %1723 = vadd.xlane.f32.xlu1 %v3835_v43  ;;  %v1420_v21 = vpop.xlane.xlu1 %1419  ;;  %v1609_v61 = vmul.f32 1.442695, %v1511_v19 }
 0x2a3   : > { %2867 = vpow2.f32 %v1607_v37  ;;  %v1512_v9 = vsub.f32 %v3607_v48, %v1420_v21  ;;  %1721 = vadd.xlane.f32.xlu0 %v3837_v7  ;;  %v1422_v40 = vpop.xlane.xlu0 %1421 }
 0x2a4   : > { %2869 = vpow2.f32 %v1605_v57  ;;  %v1513_v23 = vsub.f32 %v3610_v52, %v1422_v40 }
 0x2a5   : > { %v3843_v49 = vpop.eup %2859  ;;  %v1611_v44 = vmul.f32 1.442695, %v1512_v9 }
 0x2a6   : > { %v3845_v11 = vpop.eup %2861  ;;  %1727 = vadd.xlane.f32.xlu1 %v3843_v49  ;;  %v1424_v25 = vpop.xlane.xlu1 %1423  ;;  %v1613_v1 = vmul.f32 1.442695, %v1513_v23 }
 0x2a7   : > { %2871 = vpow2.f32 %v1611_v44  ;;  %v1514_v13 = vsub.f32 %v3615_v56, %v1424_v25  ;;  %1725 = vadd.xlane.f32.xlu0 %v3845_v11  ;;  %v1426_v48 = vpop.xlane.xlu0 %1425 }
 0x2a8   : > { %2873 = vpow2.f32 %v1609_v61  ;;  %v1515_v28 = vsub.f32 %v3618_v60, %v1426_v48 }
 0x2a9   : > { %v3851_v36 = vpop.eup %2863  ;;  %v1615_v52 = vmul.f32 1.442695, %v1514_v13 }
 0x2aa   : > { %v3853_v15 = vpop.eup %2865  ;;  %1731 = vadd.xlane.f32.xlu1 %v3851_v36  ;;  %v1428_v30 = vpop.xlane.xlu1 %1427  ;;  %v1617_v5 = vmul.f32 1.442695, %v1515_v28 }
 0x2ab   : > { %2875 = vpow2.f32 %v1615_v52  ;;  %v1516_v17 = vsub.f32 %v3623_v0, %v1428_v30  ;;  %1729 = vadd.xlane.f32.xlu0 %v3853_v15  ;;  %v1430_v56 = vpop.xlane.xlu0 %1429 }
 0x2ac   : > { %2877 = vpow2.f32 %v1613_v1  ;;  %v1517_v34 = vsub.f32 %v3626_v4, %v1430_v56 }
 0x2ad   : > { %v3859_v57 = vpop.eup %2867  ;;  %v1619_v60 = vmul.f32 1.442695, %v1516_v17 }
 0x2ae   : > { %v3861_v19 = vpop.eup %2869  ;;  %1735 = vadd.xlane.f32.xlu1 %v3859_v57  ;;  %v1432_v37 = vpop.xlane.xlu1 %1431  ;;  %v1621_v9 = vmul.f32 1.442695, %v1517_v34 }
 0x2af   : > { %2879 = vpow2.f32 %v1619_v60  ;;  %v1518_v21 = vsub.f32 %v3631_v8, %v1432_v37  ;;  %1733 = vadd.xlane.f32.xlu0 %v3861_v19  ;;  %v1434_v0 = vpop.xlane.xlu0 %1433 }
 0x2b0   : > { %2881 = vpow2.f32 %v1617_v5  ;;  %v1519_v40 = vsub.f32 %v3634_v12, %v1434_v0 }
 0x2b1   : > { %v3867_v61 = vpop.eup %2871  ;;  %v1623_v4 = vmul.f32 1.442695, %v1518_v21 }
 0x2b2   : > { %v3869_v23 = vpop.eup %2873  ;;  %1739 = vadd.xlane.f32.xlu1 %v3867_v61  ;;  %v1436_v44 = vpop.xlane.xlu1 %1435  ;;  %v1625_v13 = vmul.f32 1.442695, %v1519_v40 }
 0x2b3   : > { %2883 = vpow2.f32 %v1623_v4  ;;  %v1520_v25 = vsub.f32 %v3639_v16, %v1436_v44  ;;  %1737 = vadd.xlane.f32.xlu0 %v3869_v23  ;;  %v1438_v8 = vpop.xlane.xlu0 %1437 }
 0x2b4   : > { %2885 = vpow2.f32 %v1621_v9  ;;  %v1521_v48 = vsub.f32 %v3642_v20, %v1438_v8  ;;  %v4221_v8 = vld [vmem:[#allocation5_spill] sm:$0xff] }
 0x2b5   : > { %v3875_v1 = vpop.eup %2875  ;;  %v1627_v12 = vmul.f32 1.442695, %v1520_v25 }
 0x2b6   : > { %v3877_v28 = vpop.eup %2877  ;;  %1743 = vadd.xlane.f32.xlu1 %v3875_v1  ;;  %v1440_v52 = vpop.xlane.xlu1 %1439  ;;  %v1629_v17 = vmul.f32 1.442695, %v1521_v48 }
 0x2b7   : > { %2887 = vpow2.f32 %v1627_v12  ;;  %v1522_v30 = vsub.f32 %v3647_v24, %v1440_v52  ;;  %1741 = vadd.xlane.f32.xlu0 %v3877_v28  ;;  %v1442_v16 = vpop.xlane.xlu0 %1441 }
 0x2b8   : > { %2889 = vpow2.f32 %v1625_v13  ;;  %v1523_v56 = vsub.f32 %v3650_v29, %v1442_v16 }
 0x2b9   : > { %v3883_v5 = vpop.eup %2879  ;;  %v1631_v20 = vmul.f32 1.442695, %v1522_v30  ;;  %v4224_v30 = vld [vmem:[#allocation6_spill] sm:$0xff] }
 0x2ba   : > { %v3885_v34 = vpop.eup %2881  ;;  %1747 = vadd.xlane.f32.xlu1 %v3883_v5  ;;  %v1444_v60 = vpop.xlane.xlu1 %1443  ;;  %v1633_v21 = vmul.f32 1.442695, %v1523_v56  ;;  %v4225_v56 = vld [vmem:[#allocation7_spill] sm:$0xff] }
 0x2bb   : > { %2891 = vpow2.f32 %v1631_v20  ;;  %v1524_v37 = vsub.f32 %v3655_v35, %v1444_v60  ;;  %1745 = vadd.xlane.f32.xlu0 %v3885_v34  ;;  %v1446_v24 = vpop.xlane.xlu0 %1445 }
 0x2bc   : > { %2893 = vpow2.f32 %v1629_v17  ;;  %v1525_v0 = vsub.f32 %v3658_v42, %v1446_v24 }
 0x2bd   : > { %v3891_v9 = vpop.eup %2883  ;;  %v1635_v29 = vmul.f32 1.442695, %v1524_v37 }
 0x2be   : > { %v3893_v40 = vpop.eup %2885  ;;  %1751 = vadd.xlane.f32.xlu1 %v3891_v9  ;;  %v1448_v4 = vpop.xlane.xlu1 %1447  ;;  %v1637_v25 = vmul.f32 1.442695, %v1525_v0  ;;  %v4228_v0 = vld [vmem:[#allocation8_spill] sm:$0xff] }
 0x2bf   : > { %2895 = vpow2.f32 %v1635_v29  ;;  %v1526_v44 = vsub.f32 %v3663_v50, %v1448_v4  ;;  %1749 = vadd.xlane.f32.xlu0 %v3893_v40  ;;  %v1450_v35 = vpop.xlane.xlu0 %1449 }
 0x2c0   : > { %2897 = vpow2.f32 %v1633_v21  ;;  %v1527_v13 = vsub.f32 %v4221_v8, %v1450_v35  ;;  %v4229_v35 = vld [vmem:[#allocation9_spill] sm:$0xff] }
 0x2c1   : > { %v3899_v48 = vpop.eup %2887  ;;  %v1639_v42 = vmul.f32 1.442695, %v1526_v44 }
 0x2c2   : > { %4222 = vst [vmem:[#allocation5_spill] sm:$0xff] %v3899_v48  ;;  %v3901_v12 = vpop.eup %2889  ;;  %1755 = vadd.xlane.f32.xlu1 %v3899_v48  ;;  %v1452_v52 = vpop.xlane.xlu1 %1451  ;;  %v1641_v17 = vmul.f32 1.442695, %v1527_v13 }
 0x2c3   : > { %4223 = vst [vmem:[#allocation19_spill] sm:$0xff] %v3901_v12  ;;  %2899 = vpow2.f32 %v1639_v42  ;;  %v1528_v16 = vsub.f32 %v4224_v30, %v1452_v52  ;;  %1753 = vadd.xlane.f32.xlu0 %v3901_v12  ;;  %v1454_v50 = vpop.xlane.xlu0 %1453  ;;  %v4232_v30 = vld [vmem:[#allocation10_spill] sm:$0xff] }
 0x2c4   : > { %2901 = vpow2.f32 %v1637_v25  ;;  %v1529_v20 = vsub.f32 %v4225_v56, %v1454_v50 }
 0x2c5   : > { %v3907_v60 = vpop.eup %2891  ;;  %v1643_v37 = vmul.f32 1.442695, %v1528_v16 }
 0x2c6   : > { %4226 = vst [vmem:[#allocation6_spill] sm:$0xff] %v3907_v60  ;;  %v3909_v24 = vpop.eup %2893  ;;  %1759 = vadd.xlane.f32.xlu1 %v3907_v60  ;;  %v1456_v21 = vpop.xlane.xlu1 %1455  ;;  %v1645_v44 = vmul.f32 1.442695, %v1529_v20 }
 0x2c7   : > { %4227 = vst [vmem:[#allocation7_spill] sm:$0xff] %v3909_v24  ;;  %2903 = vpow2.f32 %v1643_v37  ;;  %v1530_v29 = vsub.f32 %v4228_v0, %v1456_v21  ;;  %1757 = vadd.xlane.f32.xlu0 %v3909_v24  ;;  %v1458_v4 = vpop.xlane.xlu0 %1457 }
 0x2c8   : > { %2905 = vpow2.f32 %v1641_v17  ;;  %v1531_v25 = vsub.f32 %v4229_v35, %v1458_v4  ;;  %v4233_v17 = vld [vmem:[#allocation11_spill] sm:$0xff]  ;;  %v4236_v4 = vld [vmem:[#allocation12_spill] sm:$0xff] }
 0x2c9   : > { %v3915_v8 = vpop.eup %2895  ;;  %v1647_v13 = vmul.f32 1.442695, %v1530_v29 }
 0x2ca   : > { %4230 = vst [vmem:[#allocation8_spill] sm:$0xff] %v3915_v8  ;;  %v3917_v42 = vpop.eup %2897  ;;  %1763 = vadd.xlane.f32.xlu1 %v3915_v8  ;;  %v1460_v52 = vpop.xlane.xlu1 %1459  ;;  %v1649_v56 = vmul.f32 1.442695, %v1531_v25 }
 0x2cb   : > { %4231 = vst [vmem:[#allocation9_spill] sm:$0xff] %v3917_v42  ;;  %2907 = vpow2.f32 %v1647_v13  ;;  %v1532_v16 = vsub.f32 %v4232_v30, %v1460_v52  ;;  %1761 = vadd.xlane.f32.xlu0 %v3917_v42  ;;  %v1462_v50 = vpop.xlane.xlu0 %1461 }
 0x2cc   : > { %2909 = vpow2.f32 %v1645_v44  ;;  %v1533_v20 = vsub.f32 %v4233_v17, %v1462_v50  ;;  %v4237_v44 = vld [vmem:[#allocation13_spill] sm:$0xff] }
 0x2cd   : > { %v3923_v37 = vpop.eup %2899  ;;  %v1651_v21 = vmul.f32 1.442695, %v1532_v16 }
 0x2ce   : > { %4234 = vst [vmem:[#allocation10_spill] sm:$0xff] %v3923_v37  ;;  %v3925_v0 = vpop.eup %2901  ;;  %1767 = vadd.xlane.f32.xlu1 %v3923_v37  ;;  %v1464_v29 = vpop.xlane.xlu1 %1463  ;;  %v1653_v52 = vmul.f32 1.442695, %v1533_v20  ;;  %v4240_v37 = vld [vmem:[#allocation14_spill] sm:$0xff] }
 0x2cf   : > { %4235 = vst [vmem:[#allocation11_spill] sm:$0xff] %v3925_v0  ;;  %2911 = vpow2.f32 %v1651_v21  ;;  %v1534_v35 = vsub.f32 %v4236_v4, %v1464_v29  ;;  %1765 = vadd.xlane.f32.xlu0 %v3925_v0  ;;  %v1466_v13 = vpop.xlane.xlu0 %1465 }
 0x2d0   : > { %2913 = vpow2.f32 %v1649_v56  ;;  %v1535_v25 = vsub.f32 %v4237_v44, %v1466_v13  ;;  %v4241_v56 = vld [vmem:[#allocation15_spill] sm:$0xff] }
 0x2d1   : > { %v3931_v30 = vpop.eup %2903  ;;  %v1655_v50 = vmul.f32 1.442695, %v1534_v35 }
 0x2d2   : > { %4238 = vst [vmem:[#allocation12_spill] sm:$0xff] %v3931_v30  ;;  %v3933_v17 = vpop.eup %2905  ;;  %1771 = vadd.xlane.f32.xlu1 %v3931_v30  ;;  %v1468_v16 = vpop.xlane.xlu1 %1467  ;;  %v1657_v4 = vmul.f32 1.442695, %v1535_v25  ;;  %v4244_v30 = vld [vmem:[#allocation16_spill] sm:$0xff] }
 0x2d3   : > { %4239 = vst [vmem:[#allocation13_spill] sm:$0xff] %v3933_v17  ;;  %2915 = vpow2.f32 %v1655_v50  ;;  %v1536_v21 = vsub.f32 %v4240_v37, %v1468_v16  ;;  %1769 = vadd.xlane.f32.xlu0 %v3933_v17  ;;  %v1470_v29 = vpop.xlane.xlu0 %1469 }
 0x2d4   : > { %2917 = vpow2.f32 %v1653_v52  ;;  %v1537_v20 = vsub.f32 %v4241_v56, %v1470_v29  ;;  %v4245_v52 = vld [vmem:[#allocation17_spill] sm:$0xff] }
 0x2d5   : > { %v3939_v0 = vpop.eup %2907  ;;  %v1659_v13 = vmul.f32 1.442695, %v1536_v21 }
 0x2d6   : > { %4242 = vst [vmem:[#allocation14_spill] sm:$0xff] %v3939_v0  ;;  %v3941_v44 = vpop.eup %2909  ;;  %1775 = vadd.xlane.f32.xlu1 %v3939_v0  ;;  %v1472_v35 = vpop.xlane.xlu1 %1471  ;;  %v1661_v16 = vmul.f32 1.442695, %v1537_v20  ;;  %v4248_v0 = vld [vmem:[#allocation18_spill] sm:$0xff] }
 0x2d7   : > { %4243 = vst [vmem:[#allocation15_spill] sm:$0xff] %v3941_v44  ;;  %2919 = vpow2.f32 %v1659_v13  ;;  %v1538_v50 = vsub.f32 %v4244_v30, %v1472_v35  ;;  %1773 = vadd.xlane.f32.xlu0 %v3941_v44  ;;  %v1474_v37 = vpop.xlane.xlu0 %1473 }
 0x2d8   : > { %2921 = vpow2.f32 %v1657_v4  ;;  %v1539_v25 = vsub.f32 %v4245_v52, %v1474_v37 }
 0x2d9   : > { %v3947_v17 = vpop.eup %2911  ;;  %v1663_v29 = vmul.f32 1.442695, %v1538_v50 }
 0x2da   : > { %4246 = vst [vmem:[#allocation16_spill] sm:$0xff] %v3947_v17  ;;  %v3949_v56 = vpop.eup %2913  ;;  %1779 = vadd.xlane.f32.xlu1 %v3947_v17  ;;  %v1476_v21 = vpop.xlane.xlu1 %1475  ;;  %v1665_v30 = vmul.f32 1.442695, %v1539_v25 }
 0x2db   : > { %4247 = vst [vmem:[#allocation17_spill] sm:$0xff] %v3949_v56  ;;  %2923 = vpow2.f32 %v1663_v29  ;;  %v1540_v13 = vsub.f32 %v4248_v0, %v1476_v21  ;;  %1777 = vadd.xlane.f32.xlu0 %v3949_v56 }
 0x2dc   : > { %2925 = vpow2.f32 %v1661_v16 }
 0x2dd   : > { %v3954_v35 = vpop.eup %2915  ;;  %v1667_v4 = vmul.f32 1.442695, %v1540_v13 }
 0x2de   : > { %4249 = vst [vmem:[#allocation18_spill] sm:$0xff] %v3954_v35  ;;  %v3956_v20 = vpop.eup %2917  ;;  %1783 = vadd.xlane.f32.xlu1 %v3954_v35 }
 0x2df   : > { %4250 = vst [vmem:[#allocation20_spill] sm:$0xff] %v3956_v20  ;;  %2927 = vpow2.f32 %v1667_v4  ;;  %1781 = vadd.xlane.f32.xlu0 %v3956_v20 }
 0x2e0   : > { %2929 = vpow2.f32 %v1665_v30 }
 0x2e1   : > { %v3960_v50 = vpop.eup %2919 }
 0x2e2   : > { %4251 = vst [vmem:[#allocation21_spill] sm:$0xff] %v3960_v50  ;;  %v3962_v37 = vpop.eup %2921  ;;  %1787 = vadd.xlane.f32.xlu1 %v3960_v50 }
 0x2e3   : > { %4252 = vst [vmem:[#allocation22_spill] sm:$0xff] %v3962_v37  ;;  %1785 = vadd.xlane.f32.xlu0 %v3962_v37 }
 0x2e5   : > { %v3966_v0 = vpop.eup %2923 }
 0x2e6   : > { %4253 = vst [vmem:[#allocation23_spill] sm:$0xff] %v3966_v0  ;;  %v3968_v16 = vpop.eup %2925  ;;  %1791 = vadd.xlane.f32.xlu1 %v3966_v0 }
 0x2e7   : > { %4254 = vst [vmem:[#allocation24_spill] sm:$0xff] %v3968_v16  ;;  %1789 = vadd.xlane.f32.xlu0 %v3968_v16 }
 0x2e9   : > { %v3972_v52 = vpop.eup %2927 }
 0x2ea   : > { %4255 = vst [vmem:[#allocation25_spill] sm:$0xff] %v3972_v52  ;;  %v3974_v25 = vpop.eup %2929  ;;  %1795 = vadd.xlane.f32.xlu1 %v3972_v52 }
 0x2eb   : > { %4256 = vst [vmem:[#allocation26_spill] sm:$0xff] %v3974_v25  ;;  %1793 = vadd.xlane.f32.xlu0 %v3974_v25 }
 0x2f7   : > { %v1672_v29 = vpop.xlane.xlu1 %1671 }
 0x2f8   : > { %2931 = vrcp.f32 %v1672_v29 }
 0x2fb   : > { %v1676_v21 = vpop.xlane.xlu1 %1675 }
 0x2fc   : > { %2933 = vrcp.f32 %v1676_v21  ;;  %v1670_v13 = vpop.xlane.xlu0 %1669 }
 0x2fd   : > { %2935 = vrcp.f32 %v1670_v13 }
 0x300   : > { %v1674_v30 = vpop.xlane.xlu0 %1673 }
 0x301   : > { %2937 = vrcp.f32 %v1674_v30 }
 0x302   : > { %v2932_v4 = vpop.eup %2931 }
 0x303   : > { %v1862_v16 = vmul.f32 %v2932_v4, %v1672_v29  ;;  %v1680_v0 = vpop.xlane.xlu1 %1679 }
 0x304   : > { %2939 = vrcp.f32 %v1680_v0  ;;  %v1678_v37 = vpop.xlane.xlu0 %1677 }
 0x305   : > { %v1926_v52 = vsub.f32 2.0, %v1862_v16  ;;  %2941 = vrcp.f32 %v1678_v37 }
 0x306   : > { %v2934_v50 = vpop.eup %2933 }
 0x307   : > { %v2936_v25 = vpop.eup %2935  ;;  %v1990_v20 = vmul.f32 %v2932_v4, %v1926_v52  ;;  %v1864_v35 = vmul.f32 %v2934_v50, %v1676_v21  ;;  %v1684_v56 = vpop.xlane.xlu1 %1683 }
 0x308   : > { %v1861_v17 = vmul.f32 %v2936_v25, %v1670_v13  ;;  %2943 = vrcp.f32 %v1684_v56  ;;  %v1682_v44 = vpop.xlane.xlu0 %1681 }
 0x309   : > { %v2054_v42 = vmul.f32 %v3729_v27, %v1990_v20  ;;  %v1928_v8 = vsub.f32 2.0, %v1864_v35  ;;  %2945 = vrcp.f32 %v1682_v44 }
 0x30a   : > { %v1925_v29 = vsub.f32 2.0, %v1861_v17 }
 0x30b   : > { %v2938_v24 = vpop.eup %2937  ;;  %2118 = vst [vmem:[%s3982_s26 + $0x8] sm:$0xff] %v2054_v42  ;;  %v1992_v16 = vmul.f32 %v2934_v50, %v1928_v8  ;;  %v1688_v60 = vpop.xlane.xlu1 %1687 }
 0x30c   : > { %v1989_v52 = vmul.f32 %v2936_v25, %v1925_v29  ;;  %v1863_v21 = vmul.f32 %v2938_v24, %v1674_v30  ;;  %2947 = vrcp.f32 %v1688_v60  ;;  %v1686_v13 = vpop.xlane.xlu0 %1685 }
 0x30d   : > { %v2056_v4 = vmul.f32 %v3734_v6, %v1992_v16  ;;  %2949 = vrcp.f32 %v1686_v13 }
 0x30e   : > { %v2940_v27 = vpop.eup %2939  ;;  %v2053_v35 = vmul.f32 %v3736_v22, %v1989_v52  ;;  %v1927_v17 = vsub.f32 2.0, %v1863_v21 }
 0x30f   : > { %v2942_v20 = vpop.eup %2941  ;;  %2120 = vst [vmem:[%s3982_s26 + $0x18] sm:$0xff] %v2056_v4  ;;  %v1866_v12 = vmul.f32 %v2940_v27, %v1680_v0  ;;  %v1692_v48 = vpop.xlane.xlu1 %1691 }
 0x310   : > { %2117 = vst [vmem:[%s3982_s26] sm:$0xff] %v2053_v35  ;;  %v1991_v42 = vmul.f32 %v2938_v24, %v1927_v17  ;;  %v1865_v8 = vmul.f32 %v2942_v20, %v1678_v37  ;;  %2951 = vrcp.f32 %v1692_v48  ;;  %v1690_v50 = vpop.xlane.xlu0 %1689 }
 0x311   : > { %v1930_v25 = vsub.f32 2.0, %v1866_v12  ;;  %2953 = vrcp.f32 %v1690_v50 }
 0x312   : > { %v2944_v30 = vpop.eup %2943  ;;  %v2055_v6 = vmul.f32 %v3742_v31, %v1991_v42  ;;  %v1929_v29 = vsub.f32 2.0, %v1865_v8 }
 0x313   : > { %v2946_v16 = vpop.eup %2945  ;;  %v1994_v22 = vmul.f32 %v2940_v27, %v1930_v25  ;;  %v1868_v52 = vmul.f32 %v2944_v30, %v1684_v56  ;;  %v1696_v21 = vpop.xlane.xlu1 %1695 }
 0x314   : > { %2119 = vst [vmem:[%s3982_s26 + $0x10] sm:$0xff] %v2055_v6  ;;  %v1993_v0 = vmul.f32 %v2942_v20, %v1929_v29  ;;  %v1867_v4 = vmul.f32 %v2946_v16, %v1682_v44  ;;  %2955 = vrcp.f32 %v1696_v21  ;;  %v1694_v24 = vpop.xlane.xlu0 %1693 }
 0x315   : > { %v2058_v37 = vmul.f32 %v3747_v26, %v1994_v22  ;;  %v1932_v35 = vsub.f32 2.0, %v1868_v52  ;;  %2957 = vrcp.f32 %v1694_v24 }
 0x316   : > { %v2948_v12 = vpop.eup %2947  ;;  %v2057_v17 = vmul.f32 %v3749_v10, %v1993_v0  ;;  %v1931_v31 = vsub.f32 2.0, %v1867_v4 }
 0x317   : > { %v2950_v42 = vpop.eup %2949  ;;  %2122 = vst [vmem:[%s3982_s26 + $0x28] sm:$0xff] %v2058_v37  ;;  %v1996_v27 = vmul.f32 %v2944_v30, %v1932_v35  ;;  %v1870_v56 = vmul.f32 %v2948_v12, %v1688_v60  ;;  %v1700_v8 = vpop.xlane.xlu1 %1699 }
 0x318   : > { %2121 = vst [vmem:[%s3982_s26 + $0x20] sm:$0xff] %v2057_v17  ;;  %v1995_v20 = vmul.f32 %v2946_v16, %v1931_v31  ;;  %v1869_v44 = vmul.f32 %v2950_v42, %v1686_v13  ;;  %2959 = vrcp.f32 %v1700_v8  ;;  %v1698_v25 = vpop.xlane.xlu0 %1697 }
 0x319   : > { %v2060_v26 = vmul.f32 %v3755_v41, %v1996_v27  ;;  %v1934_v6 = vsub.f32 2.0, %v1870_v56  ;;  %2961 = vrcp.f32 %v1698_v25 }
 0x31a   : > { %v2952_v29 = vpop.eup %2951  ;;  %v2059_v10 = vmul.f32 %v3757_v18, %v1995_v20  ;;  %v1933_v22 = vsub.f32 2.0, %v1869_v44 }
 0x31b   : > { %v2954_v52 = vpop.eup %2953  ;;  %2124 = vst [vmem:[%s3982_s26 + $0x38] sm:$0xff] %v2060_v26  ;;  %v1998_v30 = vmul.f32 %v2948_v12, %v1934_v6  ;;  %v1872_v60 = vmul.f32 %v2952_v29, %v1692_v48  ;;  %v1704_v0 = vpop.xlane.xlu1 %1703 }
 0x31c   : > { %2123 = vst [vmem:[%s3982_s26 + $0x30] sm:$0xff] %v2059_v10  ;;  %v1997_v16 = vmul.f32 %v2950_v42, %v1933_v22  ;;  %v1871_v13 = vmul.f32 %v2954_v52, %v1690_v50  ;;  %2963 = vrcp.f32 %v1704_v0  ;;  %v1702_v4 = vpop.xlane.xlu0 %1701 }
 0x31d   : > { %v2062_v41 = vmul.f32 %v3763_v47, %v1998_v30  ;;  %v1936_v37 = vsub.f32 2.0, %v1872_v60  ;;  %2965 = vrcp.f32 %v1702_v4 }
 0x31e   : > { %v2956_v35 = vpop.eup %2955  ;;  %v2061_v18 = vmul.f32 %v3765_v54, %v1997_v16  ;;  %v1935_v17 = vsub.f32 2.0, %v1871_v13 }
 0x31f   : > { %v2958_v31 = vpop.eup %2957  ;;  %2126 = vst [vmem:[%s3982_s26 + $0x48] sm:$0xff] %v2062_v41  ;;  %v2000_v12 = vmul.f32 %v2952_v29, %v1936_v37  ;;  %v1874_v48 = vmul.f32 %v2956_v35, %v1696_v21  ;;  %v1708_v27 = vpop.xlane.xlu1 %1707 }
 0x320   : > { %2125 = vst [vmem:[%s3982_s26 + $0x40] sm:$0xff] %v2061_v18  ;;  %v1999_v42 = vmul.f32 %v2954_v52, %v1935_v17  ;;  %v1873_v50 = vmul.f32 %v2958_v31, %v1694_v24  ;;  %2967 = vrcp.f32 %v1708_v27  ;;  %v1706_v56 = vpop.xlane.xlu0 %1705 }
 0x321   : > { %v2064_v47 = vmul.f32 %v3771_v38, %v2000_v12  ;;  %v1938_v20 = vsub.f32 2.0, %v1874_v48  ;;  %2969 = vrcp.f32 %v1706_v56 }
 0x322   : > { %v2960_v44 = vpop.eup %2959  ;;  %v2063_v54 = vmul.f32 %v3773_v51, %v1999_v42  ;;  %v1937_v26 = vsub.f32 2.0, %v1873_v50 }
 0x323   : > { %v2962_v6 = vpop.eup %2961  ;;  %2128 = vst [vmem:[%s3982_s26 + $0x58] sm:$0xff] %v2064_v47  ;;  %v2002_v29 = vmul.f32 %v2956_v35, %v1938_v20  ;;  %v1876_v21 = vmul.f32 %v2960_v44, %v1700_v8  ;;  %v1712_v10 = vpop.xlane.xlu1 %1711 }
 0x324   : > { %2127 = vst [vmem:[%s3982_s26 + $0x50] sm:$0xff] %v2063_v54  ;;  %v2001_v22 = vmul.f32 %v2958_v31, %v1937_v26  ;;  %v1875_v24 = vmul.f32 %v2962_v6, %v1698_v25  ;;  %2971 = vrcp.f32 %v1712_v10  ;;  %v1710_v52 = vpop.xlane.xlu0 %1709 }
 0x325   : > { %v2066_v38 = vmul.f32 %v3779_v39, %v2002_v29  ;;  %v1940_v30 = vsub.f32 2.0, %v1876_v21  ;;  %2973 = vrcp.f32 %v1710_v52 }
 0x326   : > { %v2964_v60 = vpop.eup %2963  ;;  %v2065_v51 = vmul.f32 %v3781_v58, %v2001_v22  ;;  %v1939_v16 = vsub.f32 2.0, %v1875_v24 }
 0x327   : > { %v2966_v13 = vpop.eup %2965  ;;  %2130 = vst [vmem:[%s3982_s26 + $0x68] sm:$0xff] %v2066_v38  ;;  %v2004_v41 = vmul.f32 %v2960_v44, %v1940_v30  ;;  %v1878_v8 = vmul.f32 %v2964_v60, %v1704_v0  ;;  %v1716_v37 = vpop.xlane.xlu1 %1715 }
 0x328   : > { %2129 = vst [vmem:[%s3982_s26 + $0x60] sm:$0xff] %v2065_v51  ;;  %v2003_v35 = vmul.f32 %v2962_v6, %v1939_v16  ;;  %v1877_v25 = vmul.f32 %v2966_v13, %v1702_v4  ;;  %2975 = vrcp.f32 %v1716_v37  ;;  %v1714_v18 = vpop.xlane.xlu0 %1713 }
 0x329   : > { %v2068_v39 = vmul.f32 %v3787_v62, %v2004_v41  ;;  %v1942_v17 = vsub.f32 2.0, %v1878_v8  ;;  %2977 = vrcp.f32 %v1714_v18 }
 0x32a   : > { %v2968_v31 = vpop.eup %2967  ;;  %v2067_v58 = vmul.f32 %v3789_v14, %v2003_v35  ;;  %v1941_v12 = vsub.f32 2.0, %v1877_v25 }
 0x32b   : > { %v2970_v48 = vpop.eup %2969  ;;  %2132 = vst [vmem:[%s3982_s26 + $0x78] sm:$0xff] %v2068_v39  ;;  %v2006_v42 = vmul.f32 %v2964_v60, %v1942_v17  ;;  %v1880_v0 = vmul.f32 %v2968_v31, %v1708_v27  ;;  %v1720_v50 = vpop.xlane.xlu1 %1719 }
 0x32c   : > { %2131 = vst [vmem:[%s3982_s26 + $0x70] sm:$0xff] %v2067_v58  ;;  %v2005_v47 = vmul.f32 %v2966_v13, %v1941_v12  ;;  %v1879_v4 = vmul.f32 %v2970_v48, %v1706_v56  ;;  %2979 = vrcp.f32 %v1720_v50  ;;  %v1718_v20 = vpop.xlane.xlu0 %1717 }
 0x32d   : > { %v2070_v62 = vmul.f32 %v3795_v33, %v2006_v42  ;;  %v1944_v44 = vsub.f32 2.0, %v1880_v0  ;;  %2981 = vrcp.f32 %v1718_v20 }
 0x32e   : > { %v2972_v54 = vpop.eup %2971  ;;  %v2069_v14 = vmul.f32 %v3797_v46, %v2005_v47  ;;  %v1943_v26 = vsub.f32 2.0, %v1879_v4 }
 0x32f   : > { %v2974_v6 = vpop.eup %2973  ;;  %2134 = vst [vmem:[%s3982_s26 + $0x88] sm:$0xff] %v2070_v62  ;;  %v2008_v29 = vmul.f32 %v2968_v31, %v1944_v44  ;;  %v1882_v27 = vmul.f32 %v2972_v54, %v1712_v10  ;;  %v1724_v21 = vpop.xlane.xlu1 %1723 }
 0x330   : > { %2133 = vst [vmem:[%s3982_s26 + $0x80] sm:$0xff] %v2069_v14  ;;  %v2007_v22 = vmul.f32 %v2970_v48, %v1943_v26  ;;  %v1881_v56 = vmul.f32 %v2974_v6, %v1710_v52  ;;  %2983 = vrcp.f32 %v1724_v21  ;;  %v1722_v24 = vpop.xlane.xlu0 %1721 }
 0x331   : > { %v2072_v33 = vmul.f32 %v3803_v2, %v2008_v29  ;;  %v1946_v38 = vsub.f32 2.0, %v1882_v27  ;;  %2985 = vrcp.f32 %v1722_v24 }
 0x332   : > { %v2976_v30 = vpop.eup %2975  ;;  %v2071_v46 = vmul.f32 %v3805_v55, %v2007_v22  ;;  %v1945_v60 = vsub.f32 2.0, %v1881_v56 }
 0x333   : > { %v2978_v51 = vpop.eup %2977  ;;  %2136 = vst [vmem:[%s3982_s26 + $0x98] sm:$0xff] %v2072_v33  ;;  %v2010_v16 = vmul.f32 %v2972_v54, %v1946_v38  ;;  %v1884_v10 = vmul.f32 %v2976_v30, %v1716_v37  ;;  %v1728_v13 = vpop.xlane.xlu1 %1727 }
 0x334   : > { %2135 = vst [vmem:[%s3982_s26 + $0x90] sm:$0xff] %v2071_v46  ;;  %v2009_v41 = vmul.f32 %v2974_v6, %v1945_v60  ;;  %v1883_v52 = vmul.f32 %v2978_v51, %v1714_v18  ;;  %2987 = vrcp.f32 %v1728_v13  ;;  %v1726_v8 = vpop.xlane.xlu0 %1725 }
 0x335   : > { %v2074_v2 = vmul.f32 %v3811_v45, %v2010_v16  ;;  %v1948_v35 = vsub.f32 2.0, %v1884_v10  ;;  %2989 = vrcp.f32 %v1726_v8 }
 0x336   : > { %v2980_v25 = vpop.eup %2979  ;;  %v2073_v55 = vmul.f32 %v3813_v59, %v2009_v41  ;;  %v1947_v39 = vsub.f32 2.0, %v1883_v52 }
 0x337   : > { %v2982_v17 = vpop.eup %2981  ;;  %2138 = vst [vmem:[%s3982_s26 + $0xa8] sm:$0xff] %v2074_v2  ;;  %v2012_v31 = vmul.f32 %v2976_v30, %v1948_v35  ;;  %v1886_v37 = vmul.f32 %v2980_v25, %v1720_v50  ;;  %v1732_v58 = vpop.xlane.xlu1 %1731 }
 0x338   : > { %2137 = vst [vmem:[%s3982_s26 + $0xa0] sm:$0xff] %v2073_v55  ;;  %v2011_v12 = vmul.f32 %v2978_v51, %v1947_v39  ;;  %v1885_v18 = vmul.f32 %v2982_v17, %v1718_v20  ;;  %2991 = vrcp.f32 %v1732_v58  ;;  %v1730_v48 = vpop.xlane.xlu0 %1729 }
 0x339   : > { %v2076_v45 = vmul.f32 %v3819_v32, %v2012_v31  ;;  %v1950_v42 = vsub.f32 2.0, %v1886_v37  ;;  %2993 = vrcp.f32 %v1730_v48 }
 0x33a   : > { %v2984_v0 = vpop.eup %2983  ;;  %v2075_v59 = vmul.f32 %v3821_v63, %v2011_v12  ;;  %v1949_v47 = vsub.f32 2.0, %v1885_v18 }
 0x33b   : > { %v2986_v4 = vpop.eup %2985  ;;  %2140 = vst [vmem:[%s3982_s26 + $0xb8] sm:$0xff] %v2076_v45  ;;  %v2014_v62 = vmul.f32 %v2980_v25, %v1950_v42  ;;  %v1888_v50 = vmul.f32 %v2984_v0, %v1724_v21  ;;  %v1736_v44 = vpop.xlane.xlu1 %1735 }
 0x33c   : > { %2139 = vst [vmem:[%s3982_s26 + $0xb0] sm:$0xff] %v2075_v59  ;;  %v2013_v54 = vmul.f32 %v2982_v17, %v1949_v47  ;;  %v1887_v20 = vmul.f32 %v2986_v4, %v1722_v24  ;;  %2995 = vrcp.f32 %v1736_v44  ;;  %v1734_v14 = vpop.xlane.xlu0 %1733 }
 0x33d   : > { %v2078_v32 = vmul.f32 %v3827_v53, %v2014_v62  ;;  %v1952_v26 = vsub.f32 2.0, %v1888_v50  ;;  %2997 = vrcp.f32 %v1734_v14 }
 0x33e   : > { %v2988_v6 = vpop.eup %2987  ;;  %v2077_v63 = vmul.f32 %v3829_v3, %v2013_v54  ;;  %v1951_v29 = vsub.f32 2.0, %v1887_v20 }
 0x33f   : > { %v2990_v27 = vpop.eup %2989  ;;  %2142 = vst [vmem:[%s3982_s26 + $0xc8] sm:$0xff] %v2078_v32  ;;  %v2016_v22 = vmul.f32 %v2984_v0, %v1952_v26  ;;  %v1890_v21 = vmul.f32 %v2988_v6, %v1728_v13  ;;  %v1740_v56 = vpop.xlane.xlu1 %1739 }
 0x340   : > { %2141 = vst [vmem:[%s3982_s26 + $0xc0] sm:$0xff] %v2077_v63  ;;  %v2015_v33 = vmul.f32 %v2986_v4, %v1951_v29  ;;  %v1889_v24 = vmul.f32 %v2990_v27, %v1726_v8  ;;  %2999 = vrcp.f32 %v1740_v56  ;;  %v1738_v38 = vpop.xlane.xlu0 %1737 }
 0x341   : > { %v2080_v53 = vmul.f32 %v3835_v43, %v2016_v22  ;;  %v1954_v30 = vsub.f32 2.0, %v1890_v21  ;;  %3001 = vrcp.f32 %v1738_v38 }
 0x342   : > { %v2992_v46 = vpop.eup %2991  ;;  %v2079_v3 = vmul.f32 %v3837_v7, %v2015_v33  ;;  %v1953_v60 = vsub.f32 2.0, %v1889_v24 }
 0x343   : > { %v2994_v51 = vpop.eup %2993  ;;  %2144 = vst [vmem:[%s3982_s26 + $0xd8] sm:$0xff] %v2080_v53  ;;  %v2018_v16 = vmul.f32 %v2988_v6, %v1954_v30  ;;  %v1892_v10 = vmul.f32 %v2992_v46, %v1732_v58  ;;  %v1744_v13 = vpop.xlane.xlu1 %1743 }
 0x344   : > { %2143 = vst [vmem:[%s3982_s26 + $0xd0] sm:$0xff] %v2079_v3  ;;  %v2017_v41 = vmul.f32 %v2990_v27, %v1953_v60  ;;  %v1891_v52 = vmul.f32 %v2994_v51, %v1730_v48  ;;  %3003 = vrcp.f32 %v1744_v13  ;;  %v1742_v8 = vpop.xlane.xlu0 %1741 }
 0x345   : > { %v2082_v43 = vmul.f32 %v3843_v49, %v2018_v16  ;;  %v1956_v2 = vsub.f32 2.0, %v1892_v10  ;;  %3005 = vrcp.f32 %v1742_v8 }
 0x346   : > { %v2996_v35 = vpop.eup %2995  ;;  %v2081_v7 = vmul.f32 %v3845_v11, %v2017_v41  ;;  %v1955_v25 = vsub.f32 2.0, %v1891_v52 }
 0x347   : > { %v2998_v55 = vpop.eup %2997  ;;  %2146 = vst [vmem:[%s3982_s26 + $0xe8] sm:$0xff] %v2082_v43  ;;  %v2020_v39 = vmul.f32 %v2992_v46, %v1956_v2  ;;  %v1894_v17 = vmul.f32 %v2996_v35, %v1736_v44  ;;  %v1748_v31 = vpop.xlane.xlu1 %1747 }
 0x348   : > { %2145 = vst [vmem:[%s3982_s26 + $0xe0] sm:$0xff] %v2081_v7  ;;  %v2019_v37 = vmul.f32 %v2994_v51, %v1955_v25  ;;  %v1893_v58 = vmul.f32 %v2998_v55, %v1734_v14  ;;  %3007 = vrcp.f32 %v1748_v31  ;;  %v1746_v12 = vpop.xlane.xlu0 %1745 }
 0x349   : > { %v2084_v49 = vmul.f32 %v3851_v36, %v2020_v39  ;;  %v1958_v18 = vsub.f32 2.0, %v1894_v17  ;;  %3009 = vrcp.f32 %v1746_v12 }
 0x34a   : > { %v3000_v48 = vpop.eup %2999  ;;  %v2083_v11 = vmul.f32 %v3853_v15, %v2019_v37  ;;  %v1957_v45 = vsub.f32 2.0, %v1893_v58 }
 0x34b   : > { %v3002_v42 = vpop.eup %3001  ;;  %2148 = vst [vmem:[%s3982_s26 + $0xf8] sm:$0xff] %v2084_v49  ;;  %v2022_v0 = vmul.f32 %v2996_v35, %v1958_v18  ;;  %v1896_v59 = vmul.f32 %v3000_v48, %v1740_v56  ;;  %v1752_v47 = vpop.xlane.xlu1 %1751 }
 0x34c   : > { %2147 = vst [vmem:[%s3982_s26 + $0xf0] sm:$0xff] %v2083_v11  ;;  %v2021_v4 = vmul.f32 %v2998_v55, %v1957_v45  ;;  %v1895_v62 = vmul.f32 %v3002_v42, %v1738_v38  ;;  %3011 = vrcp.f32 %v1752_v47  ;;  %v1750_v50 = vpop.xlane.xlu0 %1749 }
 0x34d   : > { %v2086_v36 = vmul.f32 %v3859_v57, %v2022_v0  ;;  %v1960_v44 = vsub.f32 2.0, %v1896_v59  ;;  %3013 = vrcp.f32 %v1750_v50 }
 0x34e   : > { %v3004_v54 = vpop.eup %3003  ;;  %v2085_v15 = vmul.f32 %v3861_v19, %v2021_v4  ;;  %v1959_v20 = vsub.f32 2.0, %v1895_v62  ;;  %v4257_v62 = vld [vmem:[#allocation5_spill] sm:$0xff] }
 0x34f   : > { %v3006_v14 = vpop.eup %3005  ;;  %2150 = vst [vmem:[%s3982_s26 + $0x108] sm:$0xff] %v2086_v36  ;;  %v2024_v32 = vmul.f32 %v3000_v48, %v1960_v44  ;;  %v1898_v26 = vmul.f32 %v3004_v54, %v1744_v13  ;;  %v1756_v6 = vpop.xlane.xlu1 %1755  ;;  %v4258_v44 = vld [vmem:[#allocation19_spill] sm:$0xff] }
 0x350   : > { %2149 = vst [vmem:[%s3982_s26 + $0x100] sm:$0xff] %v2085_v15  ;;  %v2023_v63 = vmul.f32 %v3002_v42, %v1959_v20  ;;  %v1897_v29 = vmul.f32 %v3006_v14, %v1742_v8  ;;  %3015 = vrcp.f32 %v1756_v6  ;;  %v1754_v27 = vpop.xlane.xlu0 %1753 }
 0x351   : > { %v2088_v57 = vmul.f32 %v3867_v61, %v2024_v32  ;;  %v1962_v22 = vsub.f32 2.0, %v1898_v26  ;;  %3017 = vrcp.f32 %v1754_v27 }
 0x352   : > { %v3008_v21 = vpop.eup %3007  ;;  %v2087_v19 = vmul.f32 %v3869_v23, %v2023_v63  ;;  %v1961_v56 = vsub.f32 2.0, %v1897_v29  ;;  %v4259_v29 = vld [vmem:[#allocation6_spill] sm:$0xff] }
 0x353   : > { %v3010_v33 = vpop.eup %3009  ;;  %2152 = vst [vmem:[%s3982_s26 + $0x118] sm:$0xff] %v2088_v57  ;;  %v2026_v24 = vmul.f32 %v3004_v54, %v1962_v22  ;;  %v1900_v38 = vmul.f32 %v3008_v21, %v1748_v31  ;;  %v1760_v53 = vpop.xlane.xlu1 %1759 }
 0x354   : > { %2151 = vst [vmem:[%s3982_s26 + $0x110] sm:$0xff] %v2087_v19  ;;  %v2025_v30 = vmul.f32 %v3006_v14, %v1961_v56  ;;  %v1899_v46 = vmul.f32 %v3010_v33, %v1746_v12  ;;  %3019 = vrcp.f32 %v1760_v53  ;;  %v1758_v3 = vpop.xlane.xlu0 %1757 }
 0x355   : > { %v2090_v61 = vmul.f32 %v3875_v1, %v2026_v24  ;;  %v1964_v60 = vsub.f32 2.0, %v1900_v38  ;;  %3021 = vrcp.f32 %v1758_v3 }
 0x356   : > { %v3012_v51 = vpop.eup %3011  ;;  %v2089_v23 = vmul.f32 %v3877_v28, %v2025_v30  ;;  %v1963_v16 = vsub.f32 2.0, %v1899_v46 }
 0x357   : > { %v3014_v10 = vpop.eup %3013  ;;  %2154 = vst [vmem:[%s3982_s26 + $0x128] sm:$0xff] %v2090_v61  ;;  %v2028_v13 = vmul.f32 %v3008_v21, %v1964_v60  ;;  %v1902_v41 = vmul.f32 %v3012_v51, %v1752_v47  ;;  %v1764_v52 = vpop.xlane.xlu1 %1763  ;;  %v4260_v21 = vld [vmem:[#allocation7_spill] sm:$0xff]  ;;  %v4261_v61 = vld [vmem:[#allocation8_spill] sm:$0xff] }
 0x358   : > { %2153 = vst [vmem:[%s3982_s26 + $0x120] sm:$0xff] %v2089_v23  ;;  %v2027_v8 = vmul.f32 %v3010_v33, %v1963_v16  ;;  %v1901_v43 = vmul.f32 %v3014_v10, %v1750_v50  ;;  %3023 = vrcp.f32 %v1764_v52  ;;  %v1762_v2 = vpop.xlane.xlu0 %1761  ;;  %v4262_v16 = vld [vmem:[#allocation9_spill] sm:$0xff] }
 0x359   : > { %v2092_v1 = vmul.f32 %v3883_v5, %v2028_v13  ;;  %v1966_v35 = vsub.f32 2.0, %v1902_v41  ;;  %3025 = vrcp.f32 %v1762_v2 }
 0x35a   : > { %v3016_v7 = vpop.eup %3015  ;;  %v2091_v28 = vmul.f32 %v3885_v34, %v2027_v8  ;;  %v1965_v25 = vsub.f32 2.0, %v1901_v43 }
 0x35b   : > { %v3018_v55 = vpop.eup %3017  ;;  %2156 = vst [vmem:[%s3982_s26 + $0x138] sm:$0xff] %v2092_v1  ;;  %v2030_v39 = vmul.f32 %v3012_v51, %v1966_v35  ;;  %v1904_v17 = vmul.f32 %v3016_v7, %v1756_v6  ;;  %v1768_v31 = vpop.xlane.xlu1 %1767 }
 0x35c   : > { %2155 = vst [vmem:[%s3982_s26 + $0x130] sm:$0xff] %v2091_v28  ;;  %v2029_v37 = vmul.f32 %v3014_v10, %v1965_v25  ;;  %v1903_v58 = vmul.f32 %v3018_v55, %v1754_v27  ;;  %3027 = vrcp.f32 %v1768_v31  ;;  %v1766_v12 = vpop.xlane.xlu0 %1765 }
 0x35d   : > { %v2094_v5 = vmul.f32 %v3891_v9, %v2030_v39  ;;  %v1968_v49 = vsub.f32 2.0, %v1904_v17  ;;  %3029 = vrcp.f32 %v1766_v12  ;;  %v4264_v39 = vld [vmem:[#allocation11_spill] sm:$0xff] }
 0x35e   : > { %v3020_v18 = vpop.eup %3019  ;;  %v2093_v34 = vmul.f32 %v3893_v40, %v2029_v37  ;;  %v1967_v48 = vsub.f32 2.0, %v1903_v58 }
 0x35f   : > { %v3022_v11 = vpop.eup %3021  ;;  %2158 = vst [vmem:[%s3982_s26 + $0x148] sm:$0xff] %v2094_v5  ;;  %v2032_v45 = vmul.f32 %v3016_v7, %v1968_v49  ;;  %v1906_v42 = vmul.f32 %v3020_v18, %v1760_v53  ;;  %v1772_v0 = vpop.xlane.xlu1 %1771  ;;  %v4263_v7 = vld [vmem:[#allocation10_spill] sm:$0xff] }
 0x360   : > { %2157 = vst [vmem:[%s3982_s26 + $0x140] sm:$0xff] %v2093_v34  ;;  %v2031_v59 = vmul.f32 %v3018_v55, %v1967_v48  ;;  %v1905_v47 = vmul.f32 %v3022_v11, %v1758_v3  ;;  %3031 = vrcp.f32 %v1772_v0  ;;  %v1770_v4 = vpop.xlane.xlu0 %1769  ;;  %v4265_v48 = vld [vmem:[#allocation12_spill] sm:$0xff] }
 0x361   : > { %v2096_v9 = vmul.f32 %v4257_v62, %v2032_v45  ;;  %v1970_v50 = vsub.f32 2.0, %v1906_v42  ;;  %3033 = vrcp.f32 %v1770_v4 }
 0x362   : > { %v3024_v36 = vpop.eup %3023  ;;  %v2095_v40 = vmul.f32 %v4258_v44, %v2031_v59  ;;  %v1969_v54 = vsub.f32 2.0, %v1905_v47 }
 0x363   : > { %v3026_v15 = vpop.eup %3025  ;;  %2160 = vst [vmem:[%s3982_s26 + $0x158] sm:$0xff] %v2096_v9  ;;  %v2034_v20 = vmul.f32 %v3020_v18, %v1970_v50  ;;  %v1908_v14 = vmul.f32 %v3024_v36, %v1764_v52  ;;  %v1776_v32 = vpop.xlane.xlu1 %1775 }
 0x364   : > { %2159 = vst [vmem:[%s3982_s26 + $0x150] sm:$0xff] %v2095_v40  ;;  %v2033_v26 = vmul.f32 %v3022_v11, %v1969_v54  ;;  %v1907_v6 = vmul.f32 %v3026_v15, %v1762_v2  ;;  %3035 = vrcp.f32 %v1776_v32  ;;  %v1774_v63 = vpop.xlane.xlu0 %1773  ;;  %v4267_v54 = vld [vmem:[#allocation14_spill] sm:$0xff] }
 0x365   : > { %v2098_v27 = vmul.f32 %v4259_v29, %v2034_v20  ;;  %v1972_v57 = vsub.f32 2.0, %v1908_v14  ;;  %3037 = vrcp.f32 %v1774_v63 }
 0x366   : > { %v3028_v22 = vpop.eup %3027  ;;  %v2097_v19 = vmul.f32 %v4260_v21, %v2033_v26  ;;  %v1971_v56 = vsub.f32 2.0, %v1907_v6 }
 0x367   : > { %v3030_v33 = vpop.eup %3029  ;;  %2162 = vst [vmem:[%s3982_s26 + $0x168] sm:$0xff] %v2098_v27  ;;  %v2036_v24 = vmul.f32 %v3024_v36, %v1972_v57  ;;  %v1910_v38 = vmul.f32 %v3028_v22, %v1768_v31  ;;  %v1780_v53 = vpop.xlane.xlu1 %1779 }
 0x368   : > { %2161 = vst [vmem:[%s3982_s26 + $0x160] sm:$0xff] %v2097_v19  ;;  %v2035_v30 = vmul.f32 %v3026_v15, %v1971_v56  ;;  %v1909_v46 = vmul.f32 %v3030_v33, %v1766_v12  ;;  %3039 = vrcp.f32 %v1780_v53  ;;  %v1778_v3 = vpop.xlane.xlu0 %1777  ;;  %v4269_v56 = vld [vmem:[#allocation16_spill] sm:$0xff] }
 0x369   : > { %v2100_v60 = vmul.f32 %v4261_v61, %v2036_v24  ;;  %v1974_v51 = vsub.f32 2.0, %v1910_v38  ;;  %3041 = vrcp.f32 %v1778_v3 }
 0x36a   : > { %v3032_v23 = vpop.eup %3031  ;;  %v2099_v10 = vmul.f32 %v4262_v16, %v2035_v30  ;;  %v1973_v13 = vsub.f32 2.0, %v1909_v46  ;;  %v4271_v16 = vld [vmem:[#allocation18_spill] sm:$0xff] }
 0x36b   : > { %v3034_v41 = vpop.eup %3033  ;;  %2164 = vst [vmem:[%s3982_s26 + $0x178] sm:$0xff] %v2100_v60  ;;  %v2038_v52 = vmul.f32 %v3028_v22, %v1974_v51  ;;  %v1912_v8 = vmul.f32 %v3032_v23, %v1772_v0  ;;  %v1784_v43 = vpop.xlane.xlu1 %1783  ;;  %v4266_v0 = vld [vmem:[#allocation13_spill] sm:$0xff] }
 0x36c   : > { %2163 = vst [vmem:[%s3982_s26 + $0x170] sm:$0xff] %v2099_v10  ;;  %v2037_v2 = vmul.f32 %v3030_v33, %v1973_v13  ;;  %v1911_v1 = vmul.f32 %v3034_v41, %v1770_v4  ;;  %3043 = vrcp.f32 %v1784_v43  ;;  %v1782_v35 = vpop.xlane.xlu0 %1781 }
 0x36d   : > { %v2102_v28 = vmul.f32 %v4263_v7, %v2038_v52  ;;  %v1976_v25 = vsub.f32 2.0, %v1912_v8  ;;  %3045 = vrcp.f32 %v1782_v35  ;;  %v4272_v52 = vld [vmem:[#allocation20_spill] sm:$0xff] }
 0x36e   : > { %v3036_v55 = vpop.eup %3035  ;;  %v2101_v17 = vmul.f32 %v4264_v39, %v2037_v2  ;;  %v1975_v31 = vsub.f32 2.0, %v1911_v1 }
 0x36f   : > { %v3038_v37 = vpop.eup %3037  ;;  %2166 = vst [vmem:[%s3982_s26 + $0x188] sm:$0xff] %v2102_v28  ;;  %v2040_v58 = vmul.f32 %v3032_v23, %v1976_v25  ;;  %v1914_v12 = vmul.f32 %v3036_v55, %v1776_v32  ;;  %v1788_v5 = vpop.xlane.xlu1 %1787  ;;  %v4268_v32 = vld [vmem:[#allocation15_spill] sm:$0xff]  ;;  %v4273_v25 = vld [vmem:[#allocation21_spill] sm:$0xff] }
 0x370   : > { %2165 = vst [vmem:[%s3982_s26 + $0x180] sm:$0xff] %v2101_v17  ;;  %v2039_v49 = vmul.f32 %v3034_v41, %v1975_v31  ;;  %v1913_v18 = vmul.f32 %v3038_v37, %v1774_v63  ;;  %3047 = vrcp.f32 %v1788_v5  ;;  %v1786_v34 = vpop.xlane.xlu0 %1785  ;;  %v4274_v31 = vld [vmem:[#allocation22_spill] sm:$0xff] }
 0x371   : > { %v2104_v11 = vmul.f32 %v4265_v48, %v2040_v58  ;;  %v1978_v45 = vsub.f32 2.0, %v1914_v12  ;;  %3049 = vrcp.f32 %v1786_v34  ;;  %v4275_v48 = vld [vmem:[#allocation23_spill] sm:$0xff] }
 0x372   : > { %v3040_v42 = vpop.eup %3039  ;;  %v2103_v59 = vmul.f32 %v4266_v0, %v2039_v49  ;;  %v1977_v47 = vsub.f32 2.0, %v1913_v18 }
 0x373   : > { %v3042_v4 = vpop.eup %3041  ;;  %2168 = vst [vmem:[%s3982_s26 + $0x198] sm:$0xff] %v2104_v11  ;;  %v2042_v62 = vmul.f32 %v3036_v55, %v1978_v45  ;;  %v1916_v9 = vmul.f32 %v3040_v42, %v1780_v53  ;;  %v1792_v50 = vpop.xlane.xlu1 %1791  ;;  %v4270_v53 = vld [vmem:[#allocation17_spill] sm:$0xff] }
 0x374   : > { %2167 = vst [vmem:[%s3982_s26 + $0x190] sm:$0xff] %v2103_v59  ;;  %v2041_v36 = vmul.f32 %v3038_v37, %v1977_v47  ;;  %v1915_v44 = vmul.f32 %v3042_v4, %v1778_v3  ;;  %3051 = vrcp.f32 %v1792_v50  ;;  %v1790_v40 = vpop.xlane.xlu0 %1789 }
 0x375   : > { %v2106_v15 = vmul.f32 %v4267_v54, %v2042_v62  ;;  %v1980_v20 = vsub.f32 2.0, %v1916_v9  ;;  %3053 = vrcp.f32 %v1790_v40  ;;  %v4277_v62 = vld [vmem:[#allocation25_spill] sm:$0xff] }
 0x376   : > { %v3044_v14 = vpop.eup %3043  ;;  %v2105_v26 = vmul.f32 %v4268_v32, %v2041_v36  ;;  %v1979_v6 = vsub.f32 2.0, %v1915_v44 }
 0x377   : > { %v3046_v63 = vpop.eup %3045  ;;  %2170 = vst [vmem:[%s3982_s26 + $0x1a8] sm:$0xff] %v2106_v15  ;;  %v2044_v29 = vmul.f32 %v3040_v42, %v1980_v20  ;;  %v1918_v27 = vmul.f32 %v3044_v14, %v1784_v43  ;;  %v1796_v57 = vpop.xlane.xlu1 %1795  ;;  %v4276_v42 = vld [vmem:[#allocation24_spill] sm:$0xff] }
 0x378   : > { %2169 = vst [vmem:[%s3982_s26 + $0x1a0] sm:$0xff] %v2105_v26  ;;  %v2043_v22 = vmul.f32 %v3042_v4, %v1979_v6  ;;  %v1917_v21 = vmul.f32 %v3046_v63, %v1782_v35  ;;  %3055 = vrcp.f32 %v1796_v57  ;;  %v1794_v19 = vpop.xlane.xlu0 %1793 }
 0x379   : > { %v2108_v33 = vmul.f32 %v4269_v56, %v2044_v29  ;;  %v1982_v24 = vsub.f32 2.0, %v1918_v27  ;;  %3057 = vrcp.f32 %v1794_v19 }
 0x37a   : > { %v3048_v38 = vpop.eup %3047  ;;  %v2107_v30 = vmul.f32 %v4270_v53, %v2043_v22  ;;  %v1981_v46 = vsub.f32 2.0, %v1917_v21 }
 0x37b   : > { %v3050_v3 = vpop.eup %3049  ;;  %2172 = vst [vmem:[%s3982_s26 + $0x1b8] sm:$0xff] %v2108_v33  ;;  %v2046_v61 = vmul.f32 %v3044_v14, %v1982_v24  ;;  %v1920_v60 = vmul.f32 %v3048_v38, %v1788_v5 }
 0x37c   : > { %2171 = vst [vmem:[%s3982_s26 + $0x1b0] sm:$0xff] %v2107_v30  ;;  %v2045_v51 = vmul.f32 %v3046_v63, %v1981_v46  ;;  %v1919_v23 = vmul.f32 %v3050_v3, %v1786_v34 }
 0x37d   : > { %v2110_v10 = vmul.f32 %v4271_v16, %v2046_v61  ;;  %v1984_v13 = vsub.f32 2.0, %v1920_v60 }
 0x37e   : > { %v3052_v41 = vpop.eup %3051  ;;  %v2109_v8 = vmul.f32 %v4272_v52, %v2045_v51  ;;  %v1983_v43 = vsub.f32 2.0, %v1919_v23 }
 0x37f   : > { %v3054_v2 = vpop.eup %3053  ;;  %2174 = vst [vmem:[%s3982_s26 + $0x1c8] sm:$0xff] %v2110_v10  ;;  %v2048_v1 = vmul.f32 %v3048_v38, %v1984_v13  ;;  %v1922_v35 = vmul.f32 %v3052_v41, %v1792_v50  ;;  %v4278_v50 = vld [vmem:[#allocation26_spill] sm:$0xff] }
 0x380   : > { %2173 = vst [vmem:[%s3982_s26 + $0x1c0] sm:$0xff] %v2109_v8  ;;  %v2047_v7 = vmul.f32 %v3050_v3, %v1983_v43  ;;  %v1921_v28 = vmul.f32 %v3054_v2, %v1790_v40 }
 0x381   : > { %v2112_v55 = vmul.f32 %v4273_v25, %v2048_v1  ;;  %v1986_v39 = vsub.f32 2.0, %v1922_v35 }
 0x382   : > { %v3056_v17 = vpop.eup %3055  ;;  %v2111_v37 = vmul.f32 %v4274_v31, %v2047_v7  ;;  %v1985_v58 = vsub.f32 2.0, %v1921_v28 }
 0x383   : > { %v3058_v12 = vpop.eup %3057  ;;  %2176 = vst [vmem:[%s3982_s26 + $0x1d8] sm:$0xff] %v2112_v55  ;;  %v2050_v5 = vmul.f32 %v3052_v41, %v1986_v39  ;;  %v1924_v49 = vmul.f32 %v3056_v17, %v1796_v57 }
 0x384   : > { %2175 = vst [vmem:[%s3982_s26 + $0x1d0] sm:$0xff] %v2111_v37  ;;  %v2049_v18 = vmul.f32 %v3054_v2, %v1985_v58  ;;  %v1923_v34 = vmul.f32 %v3058_v12, %v1794_v19 }
 0x385   : > { %v2114_v11 = vmul.f32 %v4275_v48, %v2050_v5  ;;  %v1988_v45 = vsub.f32 2.0, %v1924_v49 }
 0x386   : > { %v2113_v0 = vmul.f32 %v4276_v42, %v2049_v18  ;;  %v1987_v59 = vsub.f32 2.0, %v1923_v34 }
 0x387   : > { %2178 = vst [vmem:[%s3982_s26 + $0x1e8] sm:$0xff] %v2114_v11  ;;  %v2052_v47 = vmul.f32 %v3056_v17, %v1988_v45 }
 0x388   : > { %2177 = vst [vmem:[%s3982_s26 + $0x1e0] sm:$0xff] %v2113_v0  ;;  %v2051_v4 = vmul.f32 %v3058_v12, %v1987_v59 }
 0x389   : > { %v2116_v9 = vmul.f32 %v4277_v62, %v2052_v47 }
 0x38a   : > { %v2115_v36 = vmul.f32 %v4278_v50, %v2051_v4 }
 0x38b   : > { %2180 = vst [vmem:[%s3982_s26 + $0x1f8] sm:$0xff] %v2116_v9 }
 0x38c   : > { %2179 = vst [vmem:[%s3982_s26 + $0x1f0] sm:$0xff] %v2115_v36 }
 0x38d   : > { %3072 = shalt.err (!%p3069_p3)
}
 0x38e   : > { %s3073_s15 = scalar_lea.hbm %s4113_s9, 8192  ;;  %s3077_s17 = scalar_lea.hbm %s4168_s5, 16384 }
 0x38f   : > { %p3074_p4 = scmp.ne.s32.totalorder %s4113_s9, %s3073_s15  ;;  %p3078_p9 = scmp.lt.u32.totalorder %s4113_s9, %s4168_s5 }
 0x390   : > { %p3079_p10 = scmp.lt.u32.totalorder %s3077_s17, %s3073_s15  ;;  %p3081_p12 = scmp.lt.u32.totalorder %s3073_s15, %s4113_s9 }
 0x391   : > { %p3075_p7 = pnand %p3074_p4, %p3194_p5 }
 0x392   : > { %p3080_p11 = por %p3079_p10, %p3078_p9 }
 0x393   : > { %p3076_p8 = pneg %p3075_p7 }
 0x394   : > { %p3082_p13 = por %p3081_p12, %p3080_p11 }
 0x396   : > { %p3083_p0 = pnand %p3082_p13, %p3076_p8 }
 0x398   : > { %3086 = shalt.err (!%p3083_p0)
}
 0x399   : > { %s3124_s26 = smov 128   ;;  %s3125_s6 = smov 8  }
 0x39a   : > { %2762 = dma.vmem_to_hbm [thread:$0]  (%p3194_p5), %s4115_s7, 8192, %s4113_s9, %s4122_s22, %s3124_s26, %s3124_s26, %s3125_s6  }
 0x39b PF: > { %p2768_p1 = scmp.ge.s32.totalorder %s3121_s21, 2  ;;  %s2210_s8 = sand.u32 1, %s3109_s18  }
 0x39c   : > { %s2211_s10 = scalar_lea.sflag [#allocation3], %s2210_s8 }
 0x39d   : > { %p2765_p2 = pnand %p2768_p1, %p3198_p6 }
 0x39f   : > { %3104 = dma.done.wait (!%p2765_p2), %s2211_s10, 8192  }
 0x3a0   : > { %3106 = vsyncadd (!%p2765_p2), %s2211_s10, 4294959104  ;;  %p15_p3 = scmp.ge.s32.totalorder %s3181_s24, 4   ;;  %s4279_s18 = smov %s3113_s19 }
 0x3a1   : > { %s4280_s19 = smov %s3117_s20  ;;  %s4281_s20 = smov %s3192_s27 }
 0x3a2   : > { %s4282_s21 = smov %s3181_s24  ;;  %17 = sbr.rel (!%p15_p3) target bundleno = 3 (0x3), region = 75 }
 0x3a9   :  { %2216 = vsyncpa [#allocation3], 1 }
 0x3aa   :  { %2218 = vsyncpa [#allocation3 + $0x1], 1 }

</bundles_post_ra>
